<compile_context>
chip_gen: v6e
topology: v6e:2x2x1
jax: 0.10.0
libtpu: 0.0.40
codegen_flags: <defaults>
</compile_context>

<pallas_src>
import functools

import jax
import jax.numpy as jnp
import numpy as np
from jax.experimental import pallas as pl
from jax.experimental.pallas import tpu as pltpu

EPS = 1e-5
NEG_SLOPE = 0.01              # nn.LeakyReLU() default
DILATIONS = (1, 2, 4, 6)      # branch spatial dilations (depth dilation = 1)
PAD = max(DILATIONS)          # single shared spatial padding of the input


# ----------------------------------------------------------------------------
# Host-side: banded weight construction.
#
# For branch b, depth tap kd, height tap kh the per-program contribution is
#   out[h, w*Cb + co] = sum_{kw, c} xp[d+kd, h+PAD+(kh-1)*dil, w+PAD+(kw-1)*dil, c]
#                                   * W_b[kd, kh, kw, c, co]
# which is a single dense matmul
#   (H, Wp*Cin) @ BW[kd, kh, b]   with   BW of shape (Wp*Cin, W*Cb),
#   BW[(w + PAD + (kw-1)*dil)*Cin + c, w*Cb + co] = W_b[kd, kh, kw, c, co].
# ----------------------------------------------------------------------------
def build_banded_weights(w_list, Cin, Cb, W):
    """w_list[b]: (3, 3, 3, Cin, Cb) in (kd, kh, kw, c, co) order."""
    Wp = W + 2 * PAD
    bw = jnp.zeros((len(DILATIONS), 3, 3, Wp, Cin, W, Cb), jnp.float32)
    for b, dil in enumerate(DILATIONS):
        wb = w_list[b].astype(jnp.float32)
        for kw in range(3):
            off = PAD + (kw - 1) * dil               # ww = w + off
            sel = jnp.eye(Wp, W, k=-off, dtype=jnp.float32)   # sel[w+off, w]=1
            contrib = jnp.einsum('pw,dhcf->dhpcwf', sel, wb[:, :, kw])
            bw = bw.at[b].add(contrib)
    # (b, kd, kh, Wp, Cin, W, Cb) -> (kd, kh, b, Wp*Cin, W*Cb), bf16 for the MXU.
    bw = jnp.transpose(bw, (1, 2, 0, 3, 4, 5, 6))
    return bw.reshape(3, 3, len(DILATIONS), Wp * Cin, W * Cb).astype(jnp.bfloat16)


# ----------------------------------------------------------------------------
# Kernel 1: fused 4-branch dilated 3x3x3 conv + per-(n,d) BN partial stats.
# Grid (N, D, kd); kd is the depth-tap reduction axis ("arbitrary", innermost).
# ----------------------------------------------------------------------------
def _conv_kernel(x_ref, w_ref, y_ref, sum_ref, ssq_ref, acc_ref, *, H, W, Cb):
    kd = pl.program_id(2)
    WCb = W * Cb

    @pl.when(kd == 0)
    def _():
        acc_ref[...] = jnp.zeros_like(acc_ref)

    # 3 kh taps x 4 branches: each is one dense bf16 matmul whose LHS is a
    # static sublane slice of the single padded depth slice (no staging).
    for b, dil in enumerate(DILATIONS):
        for kh in range(3):
            r0 = PAD + (kh - 1) * dil                     # static row offset
            lhs = x_ref[0, 0, r0:r0 + H, :]               # (H, Wp*Cin) bf16
            part = jnp.dot(lhs, w_ref[0, kh, b],          # (H, W*Cb) f32
                           preferred_element_type=jnp.float32)
            acc_ref[:, b * WCb:(b + 1) * WCb] += part

    @pl.when(kd == pl.num_programs(2) - 1)
    def _():
        a = acc_ref[...]                                  # (H, 4*W*Cb) f32
        y_ref[...] = a.reshape(1, 1, H, 4 * WCb)
        # per-(n,d) per-column partial sums for BatchNorm batch statistics
        sum_ref[...] = jnp.sum(a, axis=0, keepdims=True).reshape(1, 1, 1, -1)
        ssq_ref[...] = jnp.sum(a * a, axis=0, keepdims=True).reshape(1, 1, 1, -1)


def fused_atrous_conv(xp4, bw, N, D, H, W, Cb):
    """xp4: (N, D+2, H+2*PAD, (W+2*PAD)*Cin) bf16; bw: (3,3,4,Wp*Cin,W*Cb) bf16."""
    Dp, Hp = D + 2, H + 2 * PAD
    WpC = xp4.shape[-1]
    WCb = W * Cb
    LC = len(DILATIONS) * WCb                      # 4*W*Cb lane columns

    kernel = functools.partial(_conv_kernel, H=H, W=W, Cb=Cb)
    return pl.pallas_call(
        kernel,
        out_shape=(
            jax.ShapeDtypeStruct((N, D, H, LC), jnp.float32),
            jax.ShapeDtypeStruct((N, D, 1, LC), jnp.float32),
            jax.ShapeDtypeStruct((N, D, 1, LC), jnp.float32),
        ),
        grid=(N, D, 3),
        in_specs=[
            # single padded depth slice per step: tiny, lane-dense, auto
            # double-buffered (depth-halo via the kd grid axis).
            pl.BlockSpec((1, 1, Hp, WpC), lambda n, d, kd: (n, d + kd, 0, 0)),
            # banded weights for this kd tap (3 kh x 4 branches), ~170 KB bf16.
            pl.BlockSpec((1, 3, len(DILATIONS), WpC, WCb),
                         lambda n, d, kd: (kd, 0, 0, 0, 0)),
        ],
        out_specs=(
            pl.BlockSpec((1, 1, H, LC), lambda n, d, kd: (n, d, 0, 0)),
            pl.BlockSpec((1, 1, 1, LC), lambda n, d, kd: (n, d, 0, 0)),
            pl.BlockSpec((1, 1, 1, LC), lambda n, d, kd: (n, d, 0, 0)),
        ),
        scratch_shapes=[pltpu.VMEM((H, LC), jnp.float32)],
        compiler_params=pltpu.CompilerParams(
            dimension_semantics=("parallel", "parallel", "arbitrary")),
    )(xp4, bw)


# ----------------------------------------------------------------------------
# Kernel 2: fused BatchNorm affine apply + LeakyReLU, lane-dense, in place.
# ----------------------------------------------------------------------------
def _bn_lrelu_kernel(y_ref, s_ref, b_ref, o_ref):
    z = y_ref[...] * s_ref[...] + b_ref[...]
    o_ref[...] = jnp.where(z >= 0, z, NEG_SLOPE * z)


def bn_leakyrelu_apply(y2, scale_cols, shift_cols):
    """y2: (R, L) f32; scale/shift: (1, L) per-column affine."""
    R, L = y2.shape
    # Keep blocks ~<= 1 MB so in+out double-buffers fit v5e's 16 MiB scoped
    # default; pl.cdiv handles non-dividing row counts (masked tail block).
    cap = max(8, (1024 * 1024) // (4 * L))
    TR = min(R, cap)
    if R >= 8:
        TR = max(8, (TR // 8) * 8)
    return pl.pallas_call(
        _bn_lrelu_kernel,
        out_shape=jax.ShapeDtypeStruct((R, L), jnp.float32),
        grid=(pl.cdiv(R, TR),),
        in_specs=[
            pl.BlockSpec((TR, L), lambda i: (i, 0)),
            pl.BlockSpec((1, L), lambda i: (0, 0)),
            pl.BlockSpec((1, L), lambda i: (0, 0)),
        ],
        out_specs=pl.BlockSpec((TR, L), lambda i: (i, 0)),
        input_output_aliases={0: 0},          # overwrite y in place
        compiler_params=pltpu.CompilerParams(
            dimension_semantics=("parallel",)),
    )(y2, scale_cols, shift_cols)


# ----------------------------------------------------------------------------
# AtrousBlock forward
# ----------------------------------------------------------------------------
def atrous_block_forward(x_ncdhw, params):
    """params: list of 4 tuples (w_dhwio (3,3,3,Cin,Cb), gamma (Cb,), beta (Cb,))."""
    N, Cin, D, H, W = x_ncdhw.shape
    Cb = params[0][0].shape[-1]
    nb = len(DILATIONS)
    Ctot = nb * Cb
    WCb = W * Cb

    # channels-last, pad once (depth by 1, spatial by max dilation), bf16 stage
    x = jnp.transpose(x_ncdhw, (0, 2, 3, 4, 1)).astype(jnp.float32)   # NDHWC
    xp = jnp.pad(x, ((0, 0), (1, 1), (PAD, PAD), (PAD, PAD), (0, 0)))
    Dp, Hp, Wp = D + 2, H + 2 * PAD, W + 2 * PAD
    xp4 = xp.astype(jnp.bfloat16).reshape(N, Dp, Hp, Wp * Cin)

    bw = build_banded_weights([p[0] for p in params], Cin, Cb, W)
    gamma_all = jnp.concatenate([p[1] for p in params])
    beta_all = jnp.concatenate([p[2] for p in params])

    y, psum, pssq = fused_atrous_conv(xp4, bw, N, D, H, W, Cb)

    # Fold training-mode BatchNorm3d batch statistics into per-channel
    # scale/shift. Columns of y are ordered (branch, w, co); the reductions
    # here are over tiny (N, D, 256) partials, not over y.
    cnt = float(N * D * H * W)
    ch_sum = psum.reshape(N, D, 1, nb, W, Cb).sum(axis=(0, 1, 2, 4)).reshape(Ctot)
    ch_ssq = pssq.reshape(N, D, 1, nb, W, Cb).sum(axis=(0, 1, 2, 4)).reshape(Ctot)
    mean = ch_sum / cnt
    var = jnp.maximum(ch_ssq / cnt - mean * mean, 0.0)
    scale = gamma_all / jnp.sqrt(var + EPS)
    shift = beta_all - mean * scale

    # broadcast per-channel affine to the (branch, w, co) column layout
    scale_cols = jnp.broadcast_to(scale.reshape(nb, 1, Cb),
                                  (nb, W, Cb)).reshape(1, nb * WCb)
    shift_cols = jnp.broadcast_to(shift.reshape(nb, 1, Cb),
                                  (nb, W, Cb)).reshape(1, nb * WCb)

    out2 = bn_leakyrelu_apply(y.reshape(N * D * H, nb * WCb),
                              scale_cols, shift_cols)

    # channels-last (n, d, h, b, w, co) -> NCDHW (n, b*Cb+co, d, h, w).
    out = out2.reshape(N, D, H, nb, W, Cb)
    out = jnp.transpose(out, (0, 3, 5, 1, 2, 4))
    return out.reshape(N, Ctot, D, H, W)


# ----------------------------------------------------------------------------
# Pure-JAX reference (in-script correctness check)
# ----------------------------------------------------------------------------
def reference_forward(x_ncdhw, params):
    outs = []
    for (w_dhwio, gamma, beta), dil in zip(params, DILATIONS):
        w_oidhw = jnp.transpose(w_dhwio, (4, 3, 0, 1, 2))  # OIDHW
        y = jax.lax.conv_general_dilated(
            x_ncdhw, w_oidhw,
            window_strides=(1, 1, 1),
            padding=((1, 1), (dil, dil), (dil, dil)),
            rhs_dilation=(1, dil, dil),
            dimension_numbers=("NCDHW", "OIDHW", "NCDHW"),
            precision=jax.lax.Precision.HIGHEST)
        mean = jnp.mean(y, axis=(0, 2, 3, 4), keepdims=True)
        var = jnp.mean((y - mean) ** 2, axis=(0, 2, 3, 4), keepdims=True)
        yn = (y - mean) / jnp.sqrt(var + EPS)
        yn = yn * gamma.reshape(1, -1, 1, 1, 1) + beta.reshape(1, -1, 1, 1, 1)
        outs.append(jnp.where(yn >= 0, yn, NEG_SLOPE * yn))
    return jnp.concatenate(outs, axis=1)


if __name__ == "__main__":
    # small shapes: batch=2, in_channels=4, out_channels=16, D=4, H=W=16
    N, Cin, D, H, W = 2, 4, 4, 16, 16
    Cout_total = 16
    Cb = Cout_total // 4  # per-branch output channels

    key = jax.random.PRNGKey(0)
    kx, *kps = jax.random.split(key, 1 + 3 * 4)

    x = jax.random.normal(kx, (N, Cin, D, H, W), dtype=jnp.float32)

    params = []
    for b in range(4):
        kw_, kg_, kb_ = kps[3 * b], kps[3 * b + 1], kps[3 * b + 2]
        # PyTorch Conv3d weight (Cout, Cin, 3, 3, 3) -> (3,3,3,Cin,Cout)
        w_pt = 0.1 * jax.random.normal(kw_, (Cb, Cin, 3, 3, 3),
                                       dtype=jnp.float32)
        w_dhwio = jnp.transpose(w_pt, (2, 3, 4, 1, 0))
        gamma = 1.0 + 0.1 * jax.random.normal(kg_, (Cb,), dtype=jnp.float32)
        beta = 0.1 * jax.random.normal(kb_, (Cb,), dtype=jnp.float32)
        params.append((w_dhwio, gamma, beta))

    out = atrous_block_forward(x, params)
    out = jax.block_until_ready(out)

    ref = jax.block_until_ready(reference_forward(x, params))
    assert out.shape == (N, Cout_total, D, H, W)
    np.testing.assert_allclose(np.asarray(out), np.asarray(ref),
                               rtol=2e-2, atol=2e-2)
    print("KERNEL_OK")
</pallas_src>

<mosaic_0001>
module attributes {stable_mosaic.version = 11 : i64} {
  func.func @_conv_kernel(%arg0: i32, %arg1: i32, %arg2: i32, %arg3: memref<1x1x28x112xbf16, #tpu.memory_space<vmem>>, %arg4: memref<1x3x4x112x64xbf16, #tpu.memory_space<vmem>>, %arg5: memref<1x1x16x256xf32, #tpu.memory_space<vmem>>, %arg6: memref<1x1x1x256xf32, #tpu.memory_space<vmem>>, %arg7: memref<1x1x1x256xf32, #tpu.memory_space<vmem>>, %arg8: memref<16x256xf32, #tpu.memory_space<vmem>>) attributes {dimension_semantics = [#tpu.dimension_semantics<parallel>, #tpu.dimension_semantics<parallel>, #tpu.dimension_semantics<arbitrary>], iteration_bounds = array<i64: 2, 4, 3>, scalar_prefetch = 0 : i64, scratch_operands = 1 : i64, tpu.core_type = #tpu.core_type<tc>, window_params = [{transform_indices = @transform_0, window_bounds = array<i64: 1, 1, 28, 112>}, {transform_indices = @transform_1, window_bounds = array<i64: 1, 3, 4, 112, 64>}, {transform_indices = @transform_2, window_bounds = array<i64: 1, 1, 16, 256>}, {transform_indices = @transform_3, window_bounds = array<i64: 1, 1, 1, 256>}, {transform_indices = @transform_4, window_bounds = array<i64: 1, 1, 1, 256>}]} {
    %c0_i32 = arith.constant 0 : i32
    %0 = arith.cmpi eq, %arg2, %c0_i32 : i32
    %1 = arith.extui %0 : i1 to i32
    %c0_i32_0 = arith.constant 0 : i32
    %2 = arith.cmpi ne, %1, %c0_i32_0 : i32
    scf.if %2 {
      %cst_155 = arith.constant 0.000000e+00 : f32
      %102 = vector.broadcast %cst_155 : f32 to vector<16x256xf32>
      %c0_156 = arith.constant 0 : index
      %c0_157 = arith.constant 0 : index
      %103 = vector.load %arg8[%c0_156, %c0_157] : memref<16x256xf32, #tpu.memory_space<vmem>>, vector<16x256xf32>
      tpu.vector_store %arg8[%c0_156, %c0_157], %102 {strides = array<i32>} : memref<16x256xf32, #tpu.memory_space<vmem>>, vector<16x256xf32>,
    } else {
    }
    %c0 = arith.constant 0 : index
    %c0_1 = arith.constant 0 : index
    %c5 = arith.constant 5 : index
    %c0_2 = arith.constant 0 : index
    %3 = vector.load %arg3[%c0, %c0_1, %c5, %c0_2] : memref<1x1x28x112xbf16, #tpu.memory_space<vmem>>, vector<1x1x16x112xbf16>
    %4 = vector.shape_cast %3 : vector<1x1x16x112xbf16> to vector<16x112xbf16>
    %c0_3 = arith.constant 0 : index
    %c0_4 = arith.constant 0 : index
    %c0_5 = arith.constant 0 : index
    %c0_6 = arith.constant 0 : index
    %c0_7 = arith.constant 0 : index
    %5 = vector.load %arg4[%c0_3, %c0_4, %c0_5, %c0_6, %c0_7] : memref<1x3x4x112x64xbf16, #tpu.memory_space<vmem>>, vector<1x1x1x112x64xbf16>
    %6 = vector.shape_cast %5 : vector<1x1x1x112x64xbf16> to vector<112x64xbf16>
    %cst = arith.constant dense<0.000000e+00> : vector<16x64xf32>
    %7 = tpu.matmul %4, %6, %cst {dimension_numbers = #tpu.dot_dimension_numbers<[1], [0], [0], [1], [0, 0, 1, 1], [], []>} : vector<16x112xbf16>, vector<112x64xbf16>, vector<16x64xf32> -> vector<16x64xf32>
    %c0_8 = arith.constant 0 : index
    %c0_9 = arith.constant 0 : index
    %8 = vector.load %arg8[%c0_8, %c0_9] : memref<16x256xf32, #tpu.memory_space<vmem>>, vector<16x64xf32>
    %9 = arith.addf %8, %7 : vector<16x64xf32>
    %c0_10 = arith.constant 0 : index
    %c0_11 = arith.constant 0 : index
    %10 = vector.load %arg8[%c0_10, %c0_11] : memref<16x256xf32, #tpu.memory_space<vmem>>, vector<16x64xf32>
    tpu.vector_store %arg8[%c0_10, %c0_11], %9 {strides = array<i32>} : memref<16x256xf32, #tpu.memory_space<vmem>>, vector<16x64xf32>,
    %c0_12 = arith.constant 0 : index
    %c0_13 = arith.constant 0 : index
    %c6 = arith.constant 6 : index
    %c0_14 = arith.constant 0 : index
    %11 = vector.load %arg3[%c0_12, %c0_13, %c6, %c0_14] : memref<1x1x28x112xbf16, #tpu.memory_space<vmem>>, vector<1x1x16x112xbf16>
    %12 = vector.shape_cast %11 : vector<1x1x16x112xbf16> to vector<16x112xbf16>
    %c0_15 = arith.constant 0 : index
    %c1 = arith.constant 1 : index
    %c0_16 = arith.constant 0 : index
    %c0_17 = arith.constant 0 : index
    %c0_18 = arith.constant 0 : index
    %13 = vector.load %arg4[%c0_15, %c1, %c0_16, %c0_17, %c0_18] : memref<1x3x4x112x64xbf16, #tpu.memory_space<vmem>>, vector<1x1x1x112x64xbf16>
    %14 = vector.shape_cast %13 : vector<1x1x1x112x64xbf16> to vector<112x64xbf16>
    %cst_19 = arith.constant dense<0.000000e+00> : vector<16x64xf32>
    %15 = tpu.matmul %12, %14, %cst_19 {dimension_numbers = #tpu.dot_dimension_numbers<[1], [0], [0], [1], [0, 0, 1, 1], [], []>} : vector<16x112xbf16>, vector<112x64xbf16>, vector<16x64xf32> -> vector<16x64xf32>
    %c0_20 = arith.constant 0 : index
    %c0_21 = arith.constant 0 : index
    %16 = vector.load %arg8[%c0_20, %c0_21] : memref<16x256xf32, #tpu.memory_space<vmem>>, vector<16x64xf32>
    %17 = arith.addf %16, %15 : vector<16x64xf32>
    %c0_22 = arith.constant 0 : index
    %c0_23 = arith.constant 0 : index
    %18 = vector.load %arg8[%c0_22, %c0_23] : memref<16x256xf32, #tpu.memory_space<vmem>>, vector<16x64xf32>
    tpu.vector_store %arg8[%c0_22, %c0_23], %17 {strides = array<i32>} : memref<16x256xf32, #tpu.memory_space<vmem>>, vector<16x64xf32>,
    %c0_24 = arith.constant 0 : index
    %c0_25 = arith.constant 0 : index
    %c7 = arith.constant 7 : index
    %c0_26 = arith.constant 0 : index
    %19 = vector.load %arg3[%c0_24, %c0_25, %c7, %c0_26] : memref<1x1x28x112xbf16, #tpu.memory_space<vmem>>, vector<1x1x16x112xbf16>
    %20 = vector.shape_cast %19 : vector<1x1x16x112xbf16> to vector<16x112xbf16>
    %c0_27 = arith.constant 0 : index
    %c2 = arith.constant 2 : index
    %c0_28 = arith.constant 0 : index
    %c0_29 = arith.constant 0 : index
    %c0_30 = arith.constant 0 : index
    %21 = vector.load %arg4[%c0_27, %c2, %c0_28, %c0_29, %c0_30] : memref<1x3x4x112x64xbf16, #tpu.memory_space<vmem>>, vector<1x1x1x112x64xbf16>
    %22 = vector.shape_cast %21 : vector<1x1x1x112x64xbf16> to vector<112x64xbf16>
    %cst_31 = arith.constant dense<0.000000e+00> : vector<16x64xf32>
    %23 = tpu.matmul %20, %22, %cst_31 {dimension_numbers = #tpu.dot_dimension_numbers<[1], [0], [0], [1], [0, 0, 1, 1], [], []>} : vector<16x112xbf16>, vector<112x64xbf16>, vector<16x64xf32> -> vector<16x64xf32>
    %c0_32 = arith.constant 0 : index
    %c0_33 = arith.constant 0 : index
    %24 = vector.load %arg8[%c0_32, %c0_33] : memref<16x256xf32, #tpu.memory_space<vmem>>, vector<16x64xf32>
    %25 = arith.addf %24, %23 : vector<16x64xf32>
    %c0_34 = arith.constant 0 : index
    %c0_35 = arith.constant 0 : index
    %26 = vector.load %arg8[%c0_34, %c0_35] : memref<16x256xf32, #tpu.memory_space<vmem>>, vector<16x64xf32>
    tpu.vector_store %arg8[%c0_34, %c0_35], %25 {strides = array<i32>} : memref<16x256xf32, #tpu.memory_space<vmem>>, vector<16x64xf32>,
    %c0_36 = arith.constant 0 : index
    %c0_37 = arith.constant 0 : index
    %c4 = arith.constant 4 : index
    %c0_38 = arith.constant 0 : index
    %27 = vector.load %arg3[%c0_36, %c0_37, %c4, %c0_38] : memref<1x1x28x112xbf16, #tpu.memory_space<vmem>>, vector<1x1x16x112xbf16>
    %28 = vector.shape_cast %27 : vector<1x1x16x112xbf16> to vector<16x112xbf16>
    %c0_39 = arith.constant 0 : index
    %c0_40 = arith.constant 0 : index
    %c1_41 = arith.constant 1 : index
    %c0_42 = arith.constant 0 : index
    %c0_43 = arith.constant 0 : index
    %29 = vector.load %arg4[%c0_39, %c0_40, %c1_41, %c0_42, %c0_43] : memref<1x3x4x112x64xbf16, #tpu.memory_space<vmem>>, vector<1x1x1x112x64xbf16>
    %30 = vector.shape_cast %29 : vector<1x1x1x112x64xbf16> to vector<112x64xbf16>
    %cst_44 = arith.constant dense<0.000000e+00> : vector<16x64xf32>
    %31 = tpu.matmul %28, %30, %cst_44 {dimension_numbers = #tpu.dot_dimension_numbers<[1], [0], [0], [1], [0, 0, 1, 1], [], []>} : vector<16x112xbf16>, vector<112x64xbf16>, vector<16x64xf32> -> vector<16x64xf32>
    %c0_45 = arith.constant 0 : index
    %c64 = arith.constant 64 : index
    %32 = vector.load %arg8[%c0_45, %c64] : memref<16x256xf32, #tpu.memory_space<vmem>>, vector<16x64xf32>
    %33 = arith.addf %32, %31 : vector<16x64xf32>
    %c0_46 = arith.constant 0 : index
    %c64_47 = arith.constant 64 : index
    %34 = vector.load %arg8[%c0_46, %c64_47] : memref<16x256xf32, #tpu.memory_space<vmem>>, vector<16x64xf32>
    tpu.vector_store %arg8[%c0_46, %c64_47], %33 {strides = array<i32>} : memref<16x256xf32, #tpu.memory_space<vmem>>, vector<16x64xf32>,
    %c0_48 = arith.constant 0 : index
    %c0_49 = arith.constant 0 : index
    %c6_50 = arith.constant 6 : index
    %c0_51 = arith.constant 0 : index
    %35 = vector.load %arg3[%c0_48, %c0_49, %c6_50, %c0_51] : memref<1x1x28x112xbf16, #tpu.memory_space<vmem>>, vector<1x1x16x112xbf16>
    %36 = vector.shape_cast %35 : vector<1x1x16x112xbf16> to vector<16x112xbf16>
    %c0_52 = arith.constant 0 : index
    %c1_53 = arith.constant 1 : index
    %c1_54 = arith.constant 1 : index
    %c0_55 = arith.constant 0 : index
    %c0_56 = arith.constant 0 : index
    %37 = vector.load %arg4[%c0_52, %c1_53, %c1_54, %c0_55, %c0_56] : memref<1x3x4x112x64xbf16, #tpu.memory_space<vmem>>, vector<1x1x1x112x64xbf16>
    %38 = vector.shape_cast %37 : vector<1x1x1x112x64xbf16> to vector<112x64xbf16>
    %cst_57 = arith.constant dense<0.000000e+00> : vector<16x64xf32>
    %39 = tpu.matmul %36, %38, %cst_57 {dimension_numbers = #tpu.dot_dimension_numbers<[1], [0], [0], [1], [0, 0, 1, 1], [], []>} : vector<16x112xbf16>, vector<112x64xbf16>, vector<16x64xf32> -> vector<16x64xf32>
    %c0_58 = arith.constant 0 : index
    %c64_59 = arith.constant 64 : index
    %40 = vector.load %arg8[%c0_58, %c64_59] : memref<16x256xf32, #tpu.memory_space<vmem>>, vector<16x64xf32>
    %41 = arith.addf %40, %39 : vector<16x64xf32>
    %c0_60 = arith.constant 0 : index
    %c64_61 = arith.constant 64 : index
    %42 = vector.load %arg8[%c0_60, %c64_61] : memref<16x256xf32, #tpu.memory_space<vmem>>, vector<16x64xf32>
    tpu.vector_store %arg8[%c0_60, %c64_61], %41 {strides = array<i32>} : memref<16x256xf32, #tpu.memory_space<vmem>>, vector<16x64xf32>,
    %c0_62 = arith.constant 0 : index
    %c0_63 = arith.constant 0 : index
    %c8 = arith.constant 8 : index
    %c0_64 = arith.constant 0 : index
    %43 = vector.load %arg3[%c0_62, %c0_63, %c8, %c0_64] : memref<1x1x28x112xbf16, #tpu.memory_space<vmem>>, vector<1x1x16x112xbf16>
    %44 = vector.shape_cast %43 : vector<1x1x16x112xbf16> to vector<16x112xbf16>
    %c0_65 = arith.constant 0 : index
    %c2_66 = arith.constant 2 : index
    %c1_67 = arith.constant 1 : index
    %c0_68 = arith.constant 0 : index
    %c0_69 = arith.constant 0 : index
    %45 = vector.load %arg4[%c0_65, %c2_66, %c1_67, %c0_68, %c0_69] : memref<1x3x4x112x64xbf16, #tpu.memory_space<vmem>>, vector<1x1x1x112x64xbf16>
    %46 = vector.shape_cast %45 : vector<1x1x1x112x64xbf16> to vector<112x64xbf16>
    %cst_70 = arith.constant dense<0.000000e+00> : vector<16x64xf32>
    %47 = tpu.matmul %44, %46, %cst_70 {dimension_numbers = #tpu.dot_dimension_numbers<[1], [0], [0], [1], [0, 0, 1, 1], [], []>} : vector<16x112xbf16>, vector<112x64xbf16>, vector<16x64xf32> -> vector<16x64xf32>
    %c0_71 = arith.constant 0 : index
    %c64_72 = arith.constant 64 : index
    %48 = vector.load %arg8[%c0_71, %c64_72] : memref<16x256xf32, #tpu.memory_space<vmem>>, vector<16x64xf32>
    %49 = arith.addf %48, %47 : vector<16x64xf32>
    %c0_73 = arith.constant 0 : index
    %c64_74 = arith.constant 64 : index
    %50 = vector.load %arg8[%c0_73, %c64_74] : memref<16x256xf32, #tpu.memory_space<vmem>>, vector<16x64xf32>
    tpu.vector_store %arg8[%c0_73, %c64_74], %49 {strides = array<i32>} : memref<16x256xf32, #tpu.memory_space<vmem>>, vector<16x64xf32>,
    %c0_75 = arith.constant 0 : index
    %c0_76 = arith.constant 0 : index
    %c2_77 = arith.constant 2 : index
    %c0_78 = arith.constant 0 : index
    %51 = vector.load %arg3[%c0_75, %c0_76, %c2_77, %c0_78] : memref<1x1x28x112xbf16, #tpu.memory_space<vmem>>, vector<1x1x16x112xbf16>
    %52 = vector.shape_cast %51 : vector<1x1x16x112xbf16> to vector<16x112xbf16>
    %c0_79 = arith.constant 0 : index
    %c0_80 = arith.constant 0 : index
    %c2_81 = arith.constant 2 : index
    %c0_82 = arith.constant 0 : index
    %c0_83 = arith.constant 0 : index
    %53 = vector.load %arg4[%c0_79, %c0_80, %c2_81, %c0_82, %c0_83] : memref<1x3x4x112x64xbf16, #tpu.memory_space<vmem>>, vector<1x1x1x112x64xbf16>
    %54 = vector.shape_cast %53 : vector<1x1x1x112x64xbf16> to vector<112x64xbf16>
    %cst_84 = arith.constant dense<0.000000e+00> : vector<16x64xf32>
    %55 = tpu.matmul %52, %54, %cst_84 {dimension_numbers = #tpu.dot_dimension_numbers<[1], [0], [0], [1], [0, 0, 1, 1], [], []>} : vector<16x112xbf16>, vector<112x64xbf16>, vector<16x64xf32> -> vector<16x64xf32>
    %c0_85 = arith.constant 0 : index
    %c128 = arith.constant 128 : index
    %56 = vector.load %arg8[%c0_85, %c128] : memref<16x256xf32, #tpu.memory_space<vmem>>, vector<16x64xf32>
    %57 = arith.addf %56, %55 : vector<16x64xf32>
    %c0_86 = arith.constant 0 : index
    %c128_87 = arith.constant 128 : index
    %58 = vector.load %arg8[%c0_86, %c128_87] : memref<16x256xf32, #tpu.memory_space<vmem>>, vector<16x64xf32>
    tpu.vector_store %arg8[%c0_86, %c128_87], %57 {strides = array<i32>} : memref<16x256xf32, #tpu.memory_space<vmem>>, vector<16x64xf32>,
    %c0_88 = arith.constant 0 : index
    %c0_89 = arith.constant 0 : index
    %c6_90 = arith.constant 6 : index
    %c0_91 = arith.constant 0 : index
    %59 = vector.load %arg3[%c0_88, %c0_89, %c6_90, %c0_91] : memref<1x1x28x112xbf16, #tpu.memory_space<vmem>>, vector<1x1x16x112xbf16>
    %60 = vector.shape_cast %59 : vector<1x1x16x112xbf16> to vector<16x112xbf16>
    %c0_92 = arith.constant 0 : index
    %c1_93 = arith.constant 1 : index
    %c2_94 = arith.constant 2 : index
    %c0_95 = arith.constant 0 : index
    %c0_96 = arith.constant 0 : index
    %61 = vector.load %arg4[%c0_92, %c1_93, %c2_94, %c0_95, %c0_96] : memref<1x3x4x112x64xbf16, #tpu.memory_space<vmem>>, vector<1x1x1x112x64xbf16>
    %62 = vector.shape_cast %61 : vector<1x1x1x112x64xbf16> to vector<112x64xbf16>
    %cst_97 = arith.constant dense<0.000000e+00> : vector<16x64xf32>
    %63 = tpu.matmul %60, %62, %cst_97 {dimension_numbers = #tpu.dot_dimension_numbers<[1], [0], [0], [1], [0, 0, 1, 1], [], []>} : vector<16x112xbf16>, vector<112x64xbf16>, vector<16x64xf32> -> vector<16x64xf32>
    %c0_98 = arith.constant 0 : index
    %c128_99 = arith.constant 128 : index
    %64 = vector.load %arg8[%c0_98, %c128_99] : memref<16x256xf32, #tpu.memory_space<vmem>>, vector<16x64xf32>
    %65 = arith.addf %64, %63 : vector<16x64xf32>
    %c0_100 = arith.constant 0 : index
    %c128_101 = arith.constant 128 : index
    %66 = vector.load %arg8[%c0_100, %c128_101] : memref<16x256xf32, #tpu.memory_space<vmem>>, vector<16x64xf32>
    tpu.vector_store %arg8[%c0_100, %c128_101], %65 {strides = array<i32>} : memref<16x256xf32, #tpu.memory_space<vmem>>, vector<16x64xf32>,
    %c0_102 = arith.constant 0 : index
    %c0_103 = arith.constant 0 : index
    %c10 = arith.constant 10 : index
    %c0_104 = arith.constant 0 : index
    %67 = vector.load %arg3[%c0_102, %c0_103, %c10, %c0_104] : memref<1x1x28x112xbf16, #tpu.memory_space<vmem>>, vector<1x1x16x112xbf16>
    %68 = vector.shape_cast %67 : vector<1x1x16x112xbf16> to vector<16x112xbf16>
    %c0_105 = arith.constant 0 : index
    %c2_106 = arith.constant 2 : index
    %c2_107 = arith.constant 2 : index
    %c0_108 = arith.constant 0 : index
    %c0_109 = arith.constant 0 : index
    %69 = vector.load %arg4[%c0_105, %c2_106, %c2_107, %c0_108, %c0_109] : memref<1x3x4x112x64xbf16, #tpu.memory_space<vmem>>, vector<1x1x1x112x64xbf16>
    %70 = vector.shape_cast %69 : vector<1x1x1x112x64xbf16> to vector<112x64xbf16>
    %cst_110 = arith.constant dense<0.000000e+00> : vector<16x64xf32>
    %71 = tpu.matmul %68, %70, %cst_110 {dimension_numbers = #tpu.dot_dimension_numbers<[1], [0], [0], [1], [0, 0, 1, 1], [], []>} : vector<16x112xbf16>, vector<112x64xbf16>, vector<16x64xf32> -> vector<16x64xf32>
    %c0_111 = arith.constant 0 : index
    %c128_112 = arith.constant 128 : index
    %72 = vector.load %arg8[%c0_111, %c128_112] : memref<16x256xf32, #tpu.memory_space<vmem>>, vector<16x64xf32>
    %73 = arith.addf %72, %71 : vector<16x64xf32>
    %c0_113 = arith.constant 0 : index
    %c128_114 = arith.constant 128 : index
    %74 = vector.load %arg8[%c0_113, %c128_114] : memref<16x256xf32, #tpu.memory_space<vmem>>, vector<16x64xf32>
    tpu.vector_store %arg8[%c0_113, %c128_114], %73 {strides = array<i32>} : memref<16x256xf32, #tpu.memory_space<vmem>>, vector<16x64xf32>,
    %c0_115 = arith.constant 0 : index
    %c0_116 = arith.constant 0 : index
    %c0_117 = arith.constant 0 : index
    %c0_118 = arith.constant 0 : index
    %75 = vector.load %arg3[%c0_115, %c0_116, %c0_117, %c0_118] : memref<1x1x28x112xbf16, #tpu.memory_space<vmem>>, vector<1x1x16x112xbf16>
    %76 = vector.shape_cast %75 : vector<1x1x16x112xbf16> to vector<16x112xbf16>
    %c0_119 = arith.constant 0 : index
    %c0_120 = arith.constant 0 : index
    %c3 = arith.constant 3 : index
    %c0_121 = arith.constant 0 : index
    %c0_122 = arith.constant 0 : index
    %77 = vector.load %arg4[%c0_119, %c0_120, %c3, %c0_121, %c0_122] : memref<1x3x4x112x64xbf16, #tpu.memory_space<vmem>>, vector<1x1x1x112x64xbf16>
    %78 = vector.shape_cast %77 : vector<1x1x1x112x64xbf16> to vector<112x64xbf16>
    %cst_123 = arith.constant dense<0.000000e+00> : vector<16x64xf32>
    %79 = tpu.matmul %76, %78, %cst_123 {dimension_numbers = #tpu.dot_dimension_numbers<[1], [0], [0], [1], [0, 0, 1, 1], [], []>} : vector<16x112xbf16>, vector<112x64xbf16>, vector<16x64xf32> -> vector<16x64xf32>
    %c0_124 = arith.constant 0 : index
    %c192 = arith.constant 192 : index
    %80 = vector.load %arg8[%c0_124, %c192] : memref<16x256xf32, #tpu.memory_space<vmem>>, vector<16x64xf32>
    %81 = arith.addf %80, %79 : vector<16x64xf32>
    %c0_125 = arith.constant 0 : index
    %c192_126 = arith.constant 192 : index
    %82 = vector.load %arg8[%c0_125, %c192_126] : memref<16x256xf32, #tpu.memory_space<vmem>>, vector<16x64xf32>
    tpu.vector_store %arg8[%c0_125, %c192_126], %81 {strides = array<i32>} : memref<16x256xf32, #tpu.memory_space<vmem>>, vector<16x64xf32>,
    %c0_127 = arith.constant 0 : index
    %c0_128 = arith.constant 0 : index
    %c6_129 = arith.constant 6 : index
    %c0_130 = arith.constant 0 : index
    %83 = vector.load %arg3[%c0_127, %c0_128, %c6_129, %c0_130] : memref<1x1x28x112xbf16, #tpu.memory_space<vmem>>, vector<1x1x16x112xbf16>
    %84 = vector.shape_cast %83 : vector<1x1x16x112xbf16> to vector<16x112xbf16>
    %c0_131 = arith.constant 0 : index
    %c1_132 = arith.constant 1 : index
    %c3_133 = arith.constant 3 : index
    %c0_134 = arith.constant 0 : index
    %c0_135 = arith.constant 0 : index
    %85 = vector.load %arg4[%c0_131, %c1_132, %c3_133, %c0_134, %c0_135] : memref<1x3x4x112x64xbf16, #tpu.memory_space<vmem>>, vector<1x1x1x112x64xbf16>
    %86 = vector.shape_cast %85 : vector<1x1x1x112x64xbf16> to vector<112x64xbf16>
    %cst_136 = arith.constant dense<0.000000e+00> : vector<16x64xf32>
    %87 = tpu.matmul %84, %86, %cst_136 {dimension_numbers = #tpu.dot_dimension_numbers<[1], [0], [0], [1], [0, 0, 1, 1], [], []>} : vector<16x112xbf16>, vector<112x64xbf16>, vector<16x64xf32> -> vector<16x64xf32>
    %c0_137 = arith.constant 0 : index
    %c192_138 = arith.constant 192 : index
    %88 = vector.load %arg8[%c0_137, %c192_138] : memref<16x256xf32, #tpu.memory_space<vmem>>, vector<16x64xf32>
    %89 = arith.addf %88, %87 : vector<16x64xf32>
    %c0_139 = arith.constant 0 : index
    %c192_140 = arith.constant 192 : index
    %90 = vector.load %arg8[%c0_139, %c192_140] : memref<16x256xf32, #tpu.memory_space<vmem>>, vector<16x64xf32>
    tpu.vector_store %arg8[%c0_139, %c192_140], %89 {strides = array<i32>} : memref<16x256xf32, #tpu.memory_space<vmem>>, vector<16x64xf32>,
    %c0_141 = arith.constant 0 : index
    %c0_142 = arith.constant 0 : index
    %c12 = arith.constant 12 : index
    %c0_143 = arith.constant 0 : index
    %91 = vector.load %arg3[%c0_141, %c0_142, %c12, %c0_143] : memref<1x1x28x112xbf16, #tpu.memory_space<vmem>>, vector<1x1x16x112xbf16>
    %92 = vector.shape_cast %91 : vector<1x1x16x112xbf16> to vector<16x112xbf16>
    %c0_144 = arith.constant 0 : index
    %c2_145 = arith.constant 2 : index
    %c3_146 = arith.constant 3 : index
    %c0_147 = arith.constant 0 : index
    %c0_148 = arith.constant 0 : index
    %93 = vector.load %arg4[%c0_144, %c2_145, %c3_146, %c0_147, %c0_148] : memref<1x3x4x112x64xbf16, #tpu.memory_space<vmem>>, vector<1x1x1x112x64xbf16>
    %94 = vector.shape_cast %93 : vector<1x1x1x112x64xbf16> to vector<112x64xbf16>
    %cst_149 = arith.constant dense<0.000000e+00> : vector<16x64xf32>
    %95 = tpu.matmul %92, %94, %cst_149 {dimension_numbers = #tpu.dot_dimension_numbers<[1], [0], [0], [1], [0, 0, 1, 1], [], []>} : vector<16x112xbf16>, vector<112x64xbf16>, vector<16x64xf32> -> vector<16x64xf32>
    %c0_150 = arith.constant 0 : index
    %c192_151 = arith.constant 192 : index
    %96 = vector.load %arg8[%c0_150, %c192_151] : memref<16x256xf32, #tpu.memory_space<vmem>>, vector<16x64xf32>
    %97 = arith.addf %96, %95 : vector<16x64xf32>
    %c0_152 = arith.constant 0 : index
    %c192_153 = arith.constant 192 : index
    %98 = vector.load %arg8[%c0_152, %c192_153] : memref<16x256xf32, #tpu.memory_space<vmem>>, vector<16x64xf32>
    tpu.vector_store %arg8[%c0_152, %c192_153], %97 {strides = array<i32>} : memref<16x256xf32, #tpu.memory_space<vmem>>, vector<16x64xf32>,
    %c2_i32 = arith.constant 2 : i32
    %99 = arith.cmpi eq, %arg2, %c2_i32 : i32
    %100 = arith.extui %99 : i1 to i32
    %c0_i32_154 = arith.constant 0 : i32
    %101 = arith.cmpi ne, %100, %c0_i32_154 : i32
    scf.if %101 {
      %c0_155 = arith.constant 0 : index
      %c0_156 = arith.constant 0 : index
      %102 = vector.load %arg8[%c0_155, %c0_156] : memref<16x256xf32, #tpu.memory_space<vmem>>, vector<16x256xf32>
      %103 = vector.shape_cast %102 : vector<16x256xf32> to vector<1x1x16x256xf32>
      %c0_157 = arith.constant 0 : index
      %c0_158 = arith.constant 0 : index
      %c0_159 = arith.constant 0 : index
      %c0_160 = arith.constant 0 : index
      %104 = vector.load %arg5[%c0_157, %c0_158, %c0_159, %c0_160] : memref<1x1x16x256xf32, #tpu.memory_space<vmem>>, vector<1x1x16x256xf32>
      tpu.vector_store %arg5[%c0_157, %c0_158, %c0_159, %c0_160], %103 {strides = array<i32>} : memref<1x1x16x256xf32, #tpu.memory_space<vmem>>, vector<1x1x16x256xf32>,
      %cst_161 = arith.constant dense<0.000000e+00> : vector<256xf32>
      %105 = vector.multi_reduction <add>, %102, %cst_161 [0] : vector<16x256xf32> to vector<256xf32>
      %106 = vector.shape_cast %105 : vector<256xf32> to vector<1x256xf32>
      %107 = vector.shape_cast %106 : vector<1x256xf32> to vector<1x1x1x256xf32>
      %c0_162 = arith.constant 0 : index
      %c0_163 = arith.constant 0 : index
      %c0_164 = arith.constant 0 : index
      %c0_165 = arith.constant 0 : index
      %108 = vector.load %arg6[%c0_162, %c0_163, %c0_164, %c0_165] : memref<1x1x1x256xf32, #tpu.memory_space<vmem>>, vector<1x1x1x256xf32>
      tpu.vector_store %arg6[%c0_162, %c0_163, %c0_164, %c0_165], %107 {strides = array<i32>} : memref<1x1x1x256xf32, #tpu.memory_space<vmem>>, vector<1x1x1x256xf32>,
      %109 = arith.mulf %102, %102 : vector<16x256xf32>
      %cst_166 = arith.constant dense<0.000000e+00> : vector<256xf32>
      %110 = vector.multi_reduction <add>, %109, %cst_166 [0] : vector<16x256xf32> to vector<256xf32>
      %111 = vector.shape_cast %110 : vector<256xf32> to vector<1x256xf32>
      %112 = vector.shape_cast %111 : vector<1x256xf32> to vector<1x1x1x256xf32>
      %c0_167 = arith.constant 0 : index
      %c0_168 = arith.constant 0 : index
      %c0_169 = arith.constant 0 : index
      %c0_170 = arith.constant 0 : index
      %113 = vector.load %arg7[%c0_167, %c0_168, %c0_169, %c0_170] : memref<1x1x1x256xf32, #tpu.memory_space<vmem>>, vector<1x1x1x256xf32>
      tpu.vector_store %arg7[%c0_167, %c0_168, %c0_169, %c0_170], %112 {strides = array<i32>} : memref<1x1x1x256xf32, #tpu.memory_space<vmem>>, vector<1x1x1x256xf32>,
    } else {
    }
    return
  }
  func.func @transform_0(%arg0: i32, %arg1: i32, %arg2: i32) -> (i32, i32, i32, i32) {
    %0 = arith.addi %arg1, %arg2 : i32
    %c0_i32 = arith.constant 0 : i32
    %c0_i32_0 = arith.constant 0 : i32
    %c0_i32_1 = arith.constant 0 : i32
    return %arg0, %0, %c0_i32, %c0_i32_0 : i32, i32, i32, i32
  }
  func.func @transform_1(%arg0: i32, %arg1: i32, %arg2: i32) -> (i32, i32, i32, i32, i32) {
    %c0_i32 = arith.constant 0 : i32
    %c0_i32_0 = arith.constant 0 : i32
    %c0_i32_1 = arith.constant 0 : i32
    %c0_i32_2 = arith.constant 0 : i32
    %c0_i32_3 = arith.constant 0 : i32
    return %arg2, %c0_i32, %c0_i32_0, %c0_i32_1, %c0_i32_2 : i32, i32, i32, i32, i32
  }
  func.func @transform_2(%arg0: i32, %arg1: i32, %arg2: i32) -> (i32, i32, i32, i32) {
    %c0_i32 = arith.constant 0 : i32
    %c0_i32_0 = arith.constant 0 : i32
    %c0_i32_1 = arith.constant 0 : i32
    return %arg0, %arg1, %c0_i32, %c0_i32_0 : i32, i32, i32, i32
  }
  func.func @transform_3(%arg0: i32, %arg1: i32, %arg2: i32) -> (i32, i32, i32, i32) {
    %c0_i32 = arith.constant 0 : i32
    %c0_i32_0 = arith.constant 0 : i32
    %c0_i32_1 = arith.constant 0 : i32
    return %arg0, %arg1, %c0_i32, %c0_i32_0 : i32, i32, i32, i32
  }
  func.func @transform_4(%arg0: i32, %arg1: i32, %arg2: i32) -> (i32, i32, i32, i32) {
    %c0_i32 = arith.constant 0 : i32
    %c0_i32_0 = arith.constant 0 : i32
    %c0_i32_1 = arith.constant 0 : i32
    return %arg0, %arg1, %c0_i32, %c0_i32_0 : i32, i32, i32, i32
  }
}

</mosaic_0001>

<bundles_post_ra>
// kernel: tpu_custom_call.1
= control target key start
LH: loop header
LB: loop body
LE: loop exit
PB: predicated region body
PF: predicated region fallthrough
CT: control target
= control target key end

     0   :  { %10 = vsyncpa [#allocation4], 0  ;;  %s3667_s0 = inlined_call_operand.vmem [shape: bf16[2,6,28,112], index: 0, kind: input, shape index: {}]   ;;  %s3668_s1 = inlined_call_operand.vmem [shape: bf16[3,3,4,112,64], index: 1, kind: input, shape index: {}]   ;;  %s3669_s2 = inlined_call_operand.hbm [shape: f32[2,4,16,256], index: 2, kind: output, shape index: {0}]   ;;  %s3670_s3 = inlined_call_operand.hbm [shape: f32[2,4,1,256], index: 3, kind: output, shape index: {1}]   ;;  %s3671_s4 = inlined_call_operand.hbm [shape: f32[2,4,1,256], index: 4, kind: output, shape index: {2}]  }
   0x1   :  { %12 = vsyncpa [#allocation4 + $0x1], 0 }
   0x2   :  { %13 = vsyncpa [#allocation6], 0 }
   0x3   :  { %15 = vsyncpa [#allocation6 + $0x1], 0  ;;  %s3148_s15 = smov 0   ;;  %s3150_s16 = smov 0  }
   0x4   :  { %s3152_s17 = smov 0   ;;  %s3154_s18 = smov 0  }
   0x5   :  { %s3156_s19 = smov 0   ;;  %s3158_s20 = smov 0  }
   0x6   :  { %s3160_s21 = smov 0   ;;  %s3162_s22 = smov 0  }
   0x7   :  { %s3164_s23 = smov 0   ;;  %s3166_s24 = smov 0  }
   0x8 LB: > { %3681 = sst [smem:[#allocation10_spill]] %s3079_s16  ;;  %s3673_s25 = sadd.s32 4294967295, %s3111_s24   ;;  %s3111_s24 = sphi %s3166_s24, %s21_s24   ;;  %s3107_s23 = sphi %s3164_s23, %s3702_s23   ;;  %s3103_s22 = sphi %s3162_s22, %s3701_s22   ;;  %s3099_s21 = sphi %s3160_s21, %s3700_s21   ;;  %s3095_s20 = sphi %s3158_s20, %s3699_s20   ;;  %s3091_s19 = sphi %s3156_s19, %s3698_s19   ;;  %s3087_s18 = sphi %s3154_s18, %s3697_s18   ;;  %s3083_s17 = sphi %s3152_s17, %s3696_s17   ;;  %s3079_s16 = sphi %s3150_s16, %s3695_s16   ;;  %s3075_s15 = sphi %s3148_s15, %s3694_s15  }
   0x9   : > { %3682 = sst [smem:[#allocation11_spill]] %s3083_s17  ;;  %s3672_s26 = sadd.s32 4294967294, %s3111_s24  }
   0xa   : > { %3683 = sst [smem:[#allocation12_spill]] %s3099_s21  ;;  %s33_s27 = sadd.s32 1, %s3099_s21 }
   0xb   : > { %3684 = sst [smem:[#allocation13_spill]] %s3103_s22  ;;  %p34_p0 = scmp.ge.s32.totalorder %s33_s27, 3 }
   0xc   : > { %3685 = sst [smem:[#allocation14_spill]] %s3107_s23  ;;  %s36_s28 = sadd.s32 1, %s3103_s22 }
   0xd   : > { %s40_s29 = sadd.s32 1, %s3107_s23  ;;  %p115_p1 = scmp.ne.s32.totalorder %s3083_s17, %s3079_s16 }
   0xe   : > { %s3704_s27 = smov (%p34_p0, %s33_s27), 0  ;;  %s3706_s28 = smov (!%p34_p0, %s36_s28), %s3103_s22 }
   0xf   : > { %3686 = sst [smem:[#allocation15_spill]] %s3704_s27  ;;  %p116_p2 = scmp.eq.s32.totalorder %s3673_s25, 23 }
  0x10   : > { %p121_p3 = scmp.ne.s32.totalorder %s3079_s16, %s3075_s15  ;;  %p38_p4 = scmp.ge.s32.totalorder %s3706_s28, 4 }
  0x11   : > { %p122_p5 = scmp.eq.s32.totalorder %s3672_s26, 23  ;;  %p3214_p6 = por %p116_p2, %p115_p1 }
  0x12   : > { %s3708_s28 = smov (%p38_p4, %s3706_s28), 0  ;;  %s3710_s29 = smov (!%p38_p4, %s40_s29), %s3107_s23 }
  0x13   : > { %3688 = sst [smem:[#allocation16_spill]] %s3708_s28  ;;  %p3221_p7 = por %p122_p5, %p121_p3 }
  0x14   : > { %p2128_p8 = scmp.ge.s32.totalorder %s3111_s24, 1  ;;  %p42_p9 = scmp.ge.s32.totalorder %s3710_s29, 2 }
  0x15   : > { %p218_p10 = scmp.lt.s32.totalorder %s3111_s24, 25  ;;  %s101_s6 = ssub.s32 %s3103_s22, %s3708_s28 }
  0x16   : > { %s3712_s29 = smov (%p42_p9, %s3710_s29), 0  ;;  %s105_s9 = sadd.s32 1, %s3083_s17 }
  0x17   : > { %3690 = sst [smem:[#allocation17_spill]] %s3712_s29  ;;  %p219_p11 = pnand %p2128_p8, %p218_p10 }
  0x18   : > { %s100_s7 = ssub.s32 %s3107_s23, %s3712_s29  ;;  %s3238_s11 = sand.u32 (!%p219_p11), 1, %s3079_s16  }
  0x19   : > { %s102_s8 = sor.u32 %s101_s6, %s100_s7  ;;  %s264_s12 = sadd.s32 (!%p219_p11), %s3087_s18, %s3091_s19 }
  0x1a   : > { %p103_p12 = scmp.eq.s32.totalorder %s102_s8, 0  ;;  %222 = sbr.rel (%p219_p11) target bundleno = 646 (0x286), region = 28 }
  0x1b   : > { %s2129_s13 = sshll.u32 (!%p219_p11), %s3238_s11, 5  ;;  %s2130_s14 = sshll.u32 (!%p219_p11), %s3238_s11, 1 }
  0x1c   : > { %s3235_s10 = scalar_select %p103_p12, %s3083_s17, %s105_s9  }
  0x1d   : > { %p265_p13 = scmp.lt.s32.totalorder (!%p219_p11), %s3095_s20, 1  ;;  %p267_p0 = scmp.lt.s32.totalorder (!%p219_p11), %s264_s12, 5 }
  0x1e   : > { %3691 = sst [smem:[#allocation18_spill]] %s3235_s10  ;;  %p275_p1 = scmp.lt.s32.totalorder (!%p219_p11), %s3087_s18, 2 }
  0x1f   : > { %s266_s6 = scalar_select %p265_p13, %s3095_s20, 1 }
  0x20   : > { %s3714_s12 = smov (!%p267_p0, %s264_s12), 5  ;;  %s3258_s17 = scalar_lea.vmem [#allocation3], %s2129_s13 }
  0x21   : > { %s2735_s7 = smul.u32 24, %s266_s6  ;;  %s2132_s8 = sshll.u32 %s3714_s12, 2 }
  0x22   : > { %s276_s27 = scalar_select %p275_p1, %s3087_s18, 2 }
  0x23   : > { %s271_s9 = sadd.s32 %s2735_s7, %s2132_s8  ;;  %s3260_s16 = scalar_lea.vmem [#allocation5], %s2130_s14 }
  0x24   : > { %s2133_s26 = sshll.u32 %s271_s9, 2  ;;  %s2736_s23 = smul.u32 672, %s276_s27 }
  0x25   : > { %s3250_s28 = scalar_lea.vmem %s3667_s0, %s2133_s26  ;;  %s3262_s12 = scalar_lea.vmem [#allocation7], %s2130_s14 }
  0x26   : > { %s3256_s10 = scalar_lea.vmem %s3668_s1, %s2736_s23  ;;  %p2135_p2 = scmp.ne.s32.totalorder %s3087_s18, 0 }
  0x28   : > { %284 = sbr.rel (%p2135_p2) target bundleno = 48 (0x30), region = 32 }
  0x2d   : > { %v3113_v0 = vmov 0.0  }
  0x2e   : > { %285 = vst [vmem:[#allocation2] sm:$0xff] %v3113_v0  ;;  %286 = vst [vmem:[#allocation2 + $0x8] sm:$0xff] %v3113_v0 }
  0x2f   : > { %287 = vst [vmem:[#allocation2 + $0x10] sm:$0xff] %v3113_v0  ;;  %288 = vst [vmem:[#allocation2 + $0x18] sm:$0xff] %v3113_v0 }
  0x30 PF: > { %v2841_v1 = vld [vmem:[%s3256_s10 + $0x30] sm:$0xff]   ;;  %v3114_v2 = vmov 0.0   ;;  %v2843_v4 = vld [vmem:[%s3256_s10 + $0x28] sm:$0xff]   ;;  %vm3115_vm0 = vmmov 0   ;;  %v2845_v6 = vld [vmem:[%s3256_s10 + $0x20] sm:$0xff]   ;;  %vm452_vm2 = vcmask 1044480  }
  0x31   : > { %2519 = vmatprep.subr.bf16.mxu0 %v3114_v2  ;;  %2537 = vmatprep.subr.bf16.mxu1 %v3114_v2  ;;  %v2842_v3 = vld [vmem:[%s3256_s10 + $0x110] sm:$0xff]   ;;  %v2844_v5 = vld [vmem:[%s3256_s10 + $0x108] sm:$0xff]   ;;  %v2846_v7 = vld [vmem:[%s3256_s10 + $0x100] sm:$0xff]   ;;  %vm314_vm1 = vsmask.f32 5376  ;;  %vm374_vm3 = vcmask 916480  }
  0x32   : > { %2520 = vmatpush3.bf16.msra.mxu0 %v2841_v1  ;;  %2533 = vmatprep.mubr.msk.bf16.mxu0 %vm3115_vm0, %v3114_v2  ;;  %v2847_v8 = vld [vmem:[%s3256_s10 + $0x18] sm:$0xff]   ;;  %v2849_v10 = vld [vmem:[%s3256_s10 + $0x10] sm:$0xff]   ;;  %v2855_v12 = vld [vmem:[%s3250_s28] sm:$0xfc]   ;;  %vm574_vm4 = vsmask.f32 4352 }
  0x33   : > { %2538 = vmatpush3.bf16.msra.mxu1 %v2842_v3  ;;  %2521 = vmatprep.subr.bf16.mxu0 %v3114_v2  ;;  %v2848_v9 = vld [vmem:[%s3256_s10 + $0xf8] sm:$0xff]   ;;  %v2850_v11 = vld [vmem:[%s3256_s10 + $0xf0] sm:$0xff]   ;;  %v2856_v13 = vld [vmem:[%s3250_s28 + $0x8] ss:$0 sps:$4 sm:$0x77]   ;;  %v316_v15 = vshrl.u32 %v2855_v12, 16 }
  0x34   : > { %2539 = vmatprep.subr.bf16.mxu1 %v3114_v2  ;;  %2551 = vmatprep.mubr.msk.bf16.mxu1 %vm3115_vm0, %v3114_v2  ;;  %v2851_v14 = vld [vmem:[%s3256_s10 + $0x8] sm:$0xff]   ;;  %v319_v16 = vshll.u32 %v2855_v12, 16  ;;  %v324_v17 = vshrl.u32 %v2856_v13, 16  ;;  %v327_v18 = vshll.u32 %v2856_v13, 16  ;;  %v2857_v20 = vld [vmem:[%s3250_s28] sm:$0xf8]  }
  0x35   : > { %v2852_v19 = vld [vmem:[%s3256_s10 + $0xe8] sm:$0xff]   ;;  %v318_v22 = vrot.slane %v316_v15, 2  ;;  %v2853_v26 = vld [vmem:[%s3256_s10] sm:$0xff]   ;;  %v453_v30 = vrot.slane %v2857_v20, 3  ;;  %v2859_v33 = vld [vmem:[%s3256_s10 + $0x1f0] sm:$0xff]   ;;  %vm710_vm5 = vcmask 1045504  }
  0x36   : > { %2522 = vmatpush3.bf16.msra.mxu0 %v2843_v4  ;;  %v2858_v21 = vld [vmem:[%s3250_s28 + $0x8] ss:$0 sps:$4 sm:$0x77]   ;;  %v321_v23 = vrot.slane %v319_v16, 3  ;;  %v326_v24 = vrot.slane %v324_v17, 2  ;;  %v329_v25 = vrot.slane %v327_v18, 3 }
  0x37   : > { %2540 = vmatpush3.bf16.msra.mxu1 %v2844_v5  ;;  %2523 = vmatprep.subr.bf16.mxu0 %v3114_v2  ;;  %v2854_v27 = vld [vmem:[%s3256_s10 + $0xe0] sm:$0xff]   ;;  %v454_v31 = vrot.slane %v2858_v21, 3  ;;  %v2860_v35 = vld [vmem:[%s3256_s10 + $0x68] sm:$0xff]   ;;  %v2864_v39 = vld [vmem:[%s3256_s10 + $0x58] sm:$0xff]   ;;  %vm1092_vm6 = vcmask 1046528   ;;  %vm423_vm7 = vcmask 523264  }
  0x38   : > { %2541 = vmatprep.subr.bf16.mxu1 %v3114_v2  ;;  %v322_v28 = vor.u32 %v321_v23, %v318_v22  ;;  %v330_v29 = vor.u32 %v329_v25, %v326_v24  ;;  %v2861_v36 = vld [vmem:[%s3256_s10 + $0x1e8] sm:$0xff]   ;;  %v2862_v37 = vld [vmem:[%s3256_s10 + $0x60] sm:$0xff]   ;;  %v2865_v41 = vld [vmem:[%s3256_s10 + $0x1d8] sm:$0xff]   ;;  %s3116_s21 = smov 64   ;;  %vm812_vm8 = vcmask 1048064   ;;  %p2408_p3 = scmp.ne.s32.totalorder %s3087_s18, 2 }
  0x39   : > { %v455_v34 = vsel %vm452_vm2, %v453_v30, %v454_v31  ;;  %v2863_v38 = vld [vmem:[%s3256_s10 + $0x1e0] sm:$0xff]   ;;  %v2874_v42 = vld [vmem:[%s3250_s28 + $0x8] ss:$0 sps:$4 sm:$0xff]   ;;  %v2866_v43 = vld [vmem:[%s3256_s10 + $0x50] sm:$0xff]  }
  0x3a   : > { %2524 = vmatpush3.bf16.msra.mxu0 %v2845_v6  ;;  %v331_v32 = vsel %vm314_vm1, %v322_v28, %v330_v29  ;;  %v2873_v40 = vld [vmem:[%s3250_s28] sm:$0xf8]   ;;  %v2867_v44 = vld [vmem:[%s3256_s10 + $0x1d0] sm:$0xff]   ;;  %v584_v47 = vshrl.u32 %v2874_v42, 16  ;;  %v587_v48 = vshll.u32 %v2874_v42, 16  ;;  %v2868_v49 = vld [vmem:[%s3256_s10 + $0x48] sm:$0xff]  }
  0x3b   : > { %2542 = vmatpush3.bf16.msra.mxu1 %v2846_v7  ;;  %2525 = vmatprep.subr.bf16.mxu0 %v3114_v2  ;;  %v576_v45 = vshrl.u32 %v2873_v40, 16  ;;  %v579_v46 = vshll.u32 %v2873_v40, 16  ;;  %v2869_v50 = vld [vmem:[%s3256_s10 + $0x1c8] sm:$0xff]   ;;  %v2870_v51 = vld [vmem:[%s3256_s10 + $0x40] sm:$0xff]   ;;  %v2872_v59 = vld [vmem:[%s3256_s10 + $0x38] sm:$0xff]  }
  0x3c   : > { %2543 = vmatprep.subr.bf16.mxu1 %v3114_v2  ;;  %v2876_v54 = vld [vmem:[%s3250_s28 + $0x8] ss:$0 sps:$4 sm:$0x33]   ;;  %v586_v55 = vrot.slane %v584_v47, 3  ;;  %v589_v56 = vrot.slane %v587_v48, 4  ;;  %v2871_v58 = vld [vmem:[%s3256_s10 + $0x1c0] sm:$0xff]  }
  0x3d   : > { %v578_v52 = vrot.slane %v576_v45, 3  ;;  %v581_v53 = vrot.slane %v579_v46, 4  ;;  %v2875_v57 = vld [vmem:[%s3250_s28] sm:$0xfc]   ;;  %v712_v63 = vrot.slane %v2876_v54, 2  ;;  %v2877_v1 = vld [vmem:[%s3256_s10 + $0x148] sm:$0xff]  }
  0x3e   : > { %2526 = vmatpush3.bf16.msra.mxu0 %v2847_v8  ;;  %v590_v61 = vor.u32 %v589_v56, %v586_v55  ;;  %v711_v62 = vrot.slane %v2875_v57, 2  ;;  %v2878_v4 = vld [vmem:[%s3256_s10 + $0x228] sm:$0xff]   ;;  %v2879_v5 = vld [vmem:[%s3256_s10 + $0x140] sm:$0xff]   ;;  %v2881_v7 = vld [vmem:[%s3256_s10 + $0x138] sm:$0xff]  }
  0x3f   : > { %2544 = vmatpush3.bf16.msra.mxu1 %v2848_v9  ;;  %2527 = vmatprep.subr.bf16.mxu0 %v3114_v2  ;;  %v582_v60 = vor.u32 %v581_v53, %v578_v52  ;;  %v2880_v6 = vld [vmem:[%s3256_s10 + $0x220] sm:$0xff]   ;;  %v2882_v8 = vld [vmem:[%s3256_s10 + $0x218] sm:$0xff]   ;;  %v2883_v9 = vld [vmem:[%s3256_s10 + $0x130] sm:$0xff]  }
  0x40   : > { %2545 = vmatprep.subr.bf16.mxu1 %v3114_v2  ;;  %v713_v3 = vsel %vm710_vm5, %v711_v62, %v712_v63  ;;  %v2886_v12 = vld [vmem:[%s3256_s10 + $0x208] sm:$0xff]   ;;  %v2887_v13 = vld [vmem:[%s3256_s10 + $0x120] sm:$0xff]   ;;  %v2889_v17 = vld [vmem:[%s3256_s10 + $0x118] sm:$0xff]  }
  0x41   : > { %v591_v0 = vsel %vm574_vm4, %v582_v60, %v590_v61  ;;  %v2891_v15 = vld [vmem:[%s3250_s28] sm:$0xf8]   ;;  %v2890_v20 = vld [vmem:[%s3256_s10 + $0x1f8] sm:$0xff]   ;;  %v2899_v28 = vld [vmem:[%s3256_s10 + $0x170] sm:$0xff]  }
  0x42   : > { %2528 = vmatpush3.bf16.msra.mxu0 %v2849_v10  ;;  %v2884_v10 = vld [vmem:[%s3256_s10 + $0x210] sm:$0xff]   ;;  %v2888_v16 = vld [vmem:[%s3256_s10 + $0x200] sm:$0xff]   ;;  %v841_v18 = vrot.slane %v2891_v15, 3  ;;  %v2896_v25 = vld [vmem:[%s3256_s10 + $0x98] sm:$0xff]  }
  0x43   : > { %2546 = vmatpush3.bf16.msra.mxu1 %v2850_v11  ;;  %2529 = vmatprep.subr.bf16.mxu0 %v3114_v2  ;;  %v2885_v11 = vld [vmem:[%s3256_s10 + $0x128] sm:$0xff]   ;;  %v2894_v23 = vld [vmem:[%s3256_s10 + $0xa0] sm:$0xff]   ;;  %v2907_v42 = vld [vmem:[%s3256_s10 + $0x150] sm:$0xff]  }
  0x44   : > { %2547 = vmatprep.subr.bf16.mxu1 %v3114_v2  ;;  %v2893_v21 = vld [vmem:[%s3250_s28 + $0x4] sm:$0xff]   ;;  %v2913_v48 = vld [vmem:[%s3256_s10 + $0xd8] sm:$0xff]   ;;  %v2923_v60 = vld [vmem:[%s3256_s10 + $0xb0] sm:$0xff]  }
  0x45   : > { %v2895_v24 = vld [vmem:[%s3256_s10 + $0x180] sm:$0xff]   ;;  %v2900_v29 = vld [vmem:[%s3256_s10 + $0x88] sm:$0xff]   ;;  %v2921_v56 = vld [vmem:[%s3256_s10 + $0xb8] sm:$0xff]  }
  0x46   : > { %2530 = vmatpush3.bf16.msra.mxu0 %v2851_v14  ;;  %v2892_v14 = vld [vmem:[%s3250_s28 + $0x8] ss:$0 sps:$4 sm:$0x77]   ;;  %v2902_v31 = vld [vmem:[%s3256_s10 + $0x80] sm:$0xff]   ;;  %v2922_v57 = vld [vmem:[%s3256_s10 + $0x238] sm:$0xff]  }
  0x47   : > { %2548 = vmatpush3.bf16.msra.mxu1 %v2852_v19  ;;  %2531 = vmatprep.subr.bf16.mxu0 %v3114_v2  ;;  %v842_v19 = vrot.slane %v2892_v14, 3  ;;  %v2901_v30 = vld [vmem:[%s3256_s10 + $0x168] sm:$0xff]   ;;  %v2912_v46 = vld [vmem:[%s3256_s10 + $0x260] sm:$0xff]   ;;  %v2924_v61 = vld [vmem:[%s3256_s10 + $0x230] sm:$0xff]  }
  0x48   : > { %2549 = vmatprep.subr.bf16.mxu1 %v3114_v2  ;;  %v2917_v52 = vld [vmem:[%s3256_s10 + $0xc8] sm:$0xff]   ;;  %v2919_v54 = vld [vmem:[%s3256_s10 + $0xc0] sm:$0xff]   ;;  %v2938_v14 = vld [vmem:[%s3256_s10 + $0x190] sm:$0xff]  }
  0x49   : > { %v843_v22 = vsel %vm452_vm2, %v841_v18, %v842_v19  ;;  %v2918_v53 = vld [vmem:[%s3256_s10 + $0x248] sm:$0xff]   ;;  %v2920_v55 = vld [vmem:[%s3256_s10 + $0x240] sm:$0xff]  }
  0x4a   : > { %2532 = vmatpush3.bf16.msra.mxu0 %v2853_v26  ;;  %v2897_v26 = vld [vmem:[%s3256_s10 + $0x178] sm:$0xff]   ;;  %v2942_v15 = vld [vmem:[%s3250_s28] sm:$0xf8]   ;;  %v2946_v19 = vld [vmem:[%s3250_s28 + $0xc] ss:$0 sps:$4 sm:$0x33]  }
  0x4b   : > { %2550 = vmatpush3.bf16.msra.mxu1 %v2854_v27  ;;  %2555 = vmatprep.subr.bf16.mxu0 %v3114_v2  ;;  %v2898_v27 = vld [vmem:[%s3256_s10 + $0x90] sm:$0xff]   ;;  %v2945_v18 = vld [vmem:[%s3250_s28 + $0x4] sm:$0xfc]  }
  0x4c   : > { %2573 = vmatprep.subr.bf16.mxu1 %v3114_v2 }
  0x4d   : > { %2534 = vmatmul.mubr.msk.bf16.vlgmr.msra.gmra.mxu0 %vm374_vm3, %v331_v32  ;;  %v2903_v32 = vld [vmem:[%s3256_s10 + $0x160] sm:$0xff]  }
  0x4e   : > { %2552 = vmatmul.mubr.msk.bf16.vlgmr.msra.gmra.mxu1 %vm374_vm3, %v455_v34  ;;  %2556 = vmatpush3.bf16.msra.mxu0 %v2859_v33  ;;  %v2904_v33 = vld [vmem:[%s3256_s10 + $0x78] sm:$0xff]   ;;  %v2909_v34 = vld [vmem:[%s3250_s28 + $0x8] ss:$0 sps:$4 sm:$0x11]  }
  0x4f   : > { %2574 = vmatpush3.bf16.msra.mxu1 %v2860_v35  ;;  %2557 = vmatprep.subr.bf16.mxu0 %v3114_v2  ;;  %v2905_v35 = vld [vmem:[%s3256_s10 + $0x158] sm:$0xff]  }
  0x50   : > { %2575 = vmatprep.subr.bf16.mxu1 %v3114_v2  ;;  %2569 = vmatprep.mubr.msk.bf16.mxu0 %vm3115_vm0, %v3114_v2 }
  0x51   : > { %2587 = vmatprep.mubr.msk.bf16.mxu1 %vm3115_vm0, %v3114_v2 }
  0x52   : > { %2558 = vmatpush3.bf16.msra.mxu0 %v2861_v36  ;;  %v2911_v36 = vld [vmem:[%s3250_s28 + $0x8] ss:$0 sps:$4 sm:$0x77]  }
  0x53   : > { %2576 = vmatpush3.bf16.msra.mxu1 %v2862_v37  ;;  %2559 = vmatprep.subr.bf16.mxu0 %v3114_v2  ;;  %v2908_v37 = vld [vmem:[%s3250_s28] sm:$0xfe]  }
  0x54   : > { %2577 = vmatprep.subr.bf16.mxu1 %v3114_v2  ;;  %v1093_v40 = vrot.slane %v2908_v37, 1 }
  0x56   : > { %2560 = vmatpush3.bf16.msra.mxu0 %v2863_v38  ;;  %v2910_v38 = vld [vmem:[%s3250_s28] sm:$0xf8]  }
  0x57   : > { %2578 = vmatpush3.bf16.msra.mxu1 %v2864_v39  ;;  %2561 = vmatprep.subr.bf16.mxu0 %v3114_v2  ;;  %v2906_v39 = vld [vmem:[%s3256_s10 + $0x70] sm:$0xff]  }
  0x58   : > { %2579 = vmatprep.subr.bf16.mxu1 %v3114_v2 }
  0x5a   : > { %2562 = vmatpush3.bf16.msra.mxu0 %v2865_v41  ;;  %v1094_v41 = vrot.slane %v2909_v34, 1 }
  0x5b   : > { %2580 = vmatpush3.bf16.msra.mxu1 %v2866_v43  ;;  %2563 = vmatprep.subr.bf16.mxu0 %v3114_v2  ;;  %v1214_v43 = vrot.slane %v2910_v38, 3 }
  0x5c   : > { %2581 = vmatprep.subr.bf16.mxu1 %v3114_v2  ;;  %v1095_v45 = vsel %vm1092_vm6, %v1093_v40, %v1094_v41 }
  0x5e   : > { %2564 = vmatpush3.bf16.msra.mxu0 %v2867_v44  ;;  %v1215_v44 = vrot.slane %v2911_v36, 3 }
  0x5f   : > { %2582 = vmatpush3.bf16.msra.mxu1 %v2868_v49  ;;  %2565 = vmatprep.subr.bf16.mxu0 %v3114_v2  ;;  %v2914_v49 = vld [vmem:[%s3256_s10 + $0x258] sm:$0xff]  }
  0x60   : > { %2583 = vmatprep.subr.bf16.mxu1 %v3114_v2  ;;  %v1216_v47 = vsel %vm452_vm2, %v1214_v43, %v1215_v44 }
  0x62   : > { %2566 = vmatpush3.bf16.msra.mxu0 %v2869_v50  ;;  %v2915_v50 = vld [vmem:[%s3256_s10 + $0xd0] sm:$0xff]  }
  0x63   : > { %2584 = vmatpush3.bf16.msra.mxu1 %v2870_v51  ;;  %2567 = vmatprep.subr.bf16.mxu0 %v3114_v2  ;;  %v2916_v51 = vld [vmem:[%s3256_s10 + $0x250] sm:$0xff]  }
  0x64   : > { %2585 = vmatprep.subr.bf16.mxu1 %v3114_v2 }
  0x66   : > { %2568 = vmatpush3.bf16.msra.mxu0 %v2871_v58  ;;  %v2926_v58 = vld [vmem:[%s3250_s28 + $0x4] sm:$0xfe]  }
  0x67   : > { %2586 = vmatpush3.bf16.msra.mxu1 %v2872_v59  ;;  %2591 = vmatprep.subr.bf16.mxu0 %v3114_v2  ;;  %v2927_v59 = vld [vmem:[%s3250_s28 + $0xc] ss:$0 sps:$4 sm:$0x11]   ;;  %v1335_v62 = vrot.slane %v2926_v58, 1 }
  0x68   : > { %2609 = vmatprep.subr.bf16.mxu1 %v3114_v2  ;;  %v1336_v63 = vrot.slane %v2927_v59, 1 }
  0x69   : > { %2570 = vmatmul.mubr.msk.bf16.vlgmr.msra.gmra.mxu0 %vm374_vm3, %v591_v0  ;;  %v2925_v0 = vld [vmem:[%s3256_s10 + $0xa8] sm:$0xff]  }
  0x6a   : > { %2588 = vmatmul.mubr.msk.bf16.vlgmr.msra.gmra.mxu1 %vm374_vm3, %v713_v3  ;;  %2592 = vmatpush3.bf16.msra.mxu0 %v2877_v1  ;;  %v1337_v1 = vsel %vm1092_vm6, %v1335_v62, %v1336_v63  ;;  %v2928_v3 = vld [vmem:[%s3250_s28] sm:$0xff]   ;;  %v1182_v63 = vld [vmem:[#allocation2 + $0x8] sm:$0xff] }
  0x6b   : > { %2610 = vmatpush3.bf16.msra.mxu1 %v2878_v4  ;;  %2593 = vmatprep.subr.bf16.mxu0 %v3114_v2  ;;  %v2929_v4 = vld [vmem:[%s3256_s10 + $0x1b8] sm:$0xff]  }
  0x6c   : > { %2611 = vmatprep.subr.bf16.mxu1 %v3114_v2  ;;  %2605 = vmatprep.mubr.msk.bf16.mxu0 %vm3115_vm0, %v3114_v2 }
  0x6d   : > { %2623 = vmatprep.mubr.msk.bf16.mxu1 %vm3115_vm0, %v3114_v2 }
  0x6e   : > { %2594 = vmatpush3.bf16.msra.mxu0 %v2879_v5  ;;  %v2931_v5 = vld [vmem:[%s3256_s10 + $0x298] sm:$0xff]  }
  0x6f   : > { %2612 = vmatpush3.bf16.msra.mxu1 %v2880_v6  ;;  %2595 = vmatprep.subr.bf16.mxu0 %v3114_v2  ;;  %v2930_v6 = vld [vmem:[%s3256_s10 + $0x1b0] sm:$0xff]  }
  0x70   : > { %2613 = vmatprep.subr.bf16.mxu1 %v3114_v2 }
  0x72   : > { %2596 = vmatpush3.bf16.msra.mxu0 %v2881_v7  ;;  %v2933_v7 = vld [vmem:[%s3256_s10 + $0x290] sm:$0xff]  }
  0x73   : > { %2614 = vmatpush3.bf16.msra.mxu1 %v2882_v8  ;;  %2597 = vmatprep.subr.bf16.mxu0 %v3114_v2  ;;  %v2932_v8 = vld [vmem:[%s3256_s10 + $0x1a8] sm:$0xff]  }
  0x74   : > { %2615 = vmatprep.subr.bf16.mxu1 %v3114_v2 }
  0x76   : > { %2598 = vmatpush3.bf16.msra.mxu0 %v2883_v9  ;;  %v2935_v9 = vld [vmem:[%s3256_s10 + $0x288] sm:$0xff]  }
  0x77   : > { %2616 = vmatpush3.bf16.msra.mxu1 %v2884_v10  ;;  %2599 = vmatprep.subr.bf16.mxu0 %v3114_v2  ;;  %v2934_v10 = vld [vmem:[%s3256_s10 + $0x1a0] sm:$0xff]  }
  0x78   : > { %2617 = vmatprep.subr.bf16.mxu1 %v3114_v2 }
  0x7a   : > { %2600 = vmatpush3.bf16.msra.mxu0 %v2885_v11  ;;  %v2937_v11 = vld [vmem:[%s3256_s10 + $0x280] sm:$0xff]  }
  0x7b   : > { %2618 = vmatpush3.bf16.msra.mxu1 %v2886_v12  ;;  %2601 = vmatprep.subr.bf16.mxu0 %v3114_v2  ;;  %v2936_v12 = vld [vmem:[%s3256_s10 + $0x198] sm:$0xff]  }
  0x7c   : > { %2619 = vmatprep.subr.bf16.mxu1 %v3114_v2 }
  0x7e   : > { %2602 = vmatpush3.bf16.msra.mxu0 %v2887_v13  ;;  %v2939_v13 = vld [vmem:[%s3256_s10 + $0x278] sm:$0xff]  }
  0x7f   : > { %2620 = vmatpush3.bf16.msra.mxu1 %v2888_v16  ;;  %2603 = vmatprep.subr.bf16.mxu0 %v3114_v2  ;;  %v2943_v16 = vld [vmem:[%s3250_s28 + $0x8] ss:$0 sps:$4 sm:$0x77]  }
  0x80   : > { %2621 = vmatprep.subr.bf16.mxu1 %v3114_v2 }
  0x82   : > { %2604 = vmatpush3.bf16.msra.mxu0 %v2889_v17  ;;  %v2941_v17 = vld [vmem:[%s3256_s10 + $0x270] sm:$0xff]  }
  0x83   : > { %2622 = vmatpush3.bf16.msra.mxu1 %v2890_v20  ;;  %2627 = vmatprep.subr.bf16.mxu0 %v3114_v2  ;;  %v2940_v20 = vld [vmem:[%s3256_s10 + $0x188] sm:$0xff]  }
  0x84   : > { %2645 = vmatprep.subr.bf16.mxu1 %v3114_v2 }
  0x85   : > { %2606 = vmatmul.mubr.msk.bf16.vlgmr.msra.gmra.mxu0 %vm374_vm3, %v843_v22  ;;  %v1579_v22 = vrot.slane %v2943_v16, 3 }
  0x86   : > { %2624 = vmatmul.mubr.msk.bf16.vlgmr.msra.gmra.mxu1 %vm374_vm3, %v2893_v21  ;;  %2628 = vmatpush3.bf16.msra.mxu0 %v2894_v23  ;;  %v1578_v21 = vrot.slane %v2942_v15, 3  ;;  %v2944_v23 = vld [vmem:[%s3256_s10 + $0x268] sm:$0xff]  }
  0x87   : > { %2646 = vmatpush3.bf16.msra.mxu1 %v2895_v24  ;;  %2629 = vmatprep.subr.bf16.mxu0 %v3114_v2  ;;  %v1707_v24 = vrot.slane %v2945_v18, 2 }
  0x88   : > { %2647 = vmatprep.subr.bf16.mxu1 %v3114_v2  ;;  %2641 = vmatprep.mubr.msk.bf16.mxu0 %vm3115_vm0, %v3114_v2 }
  0x89   : > { %2659 = vmatprep.mubr.msk.bf16.mxu1 %vm3115_vm0, %v3114_v2 }
  0x8a   : > { %2630 = vmatpush3.bf16.msra.mxu0 %v2896_v25  ;;  %v1708_v25 = vrot.slane %v2946_v19, 2 }
  0x8b   : > { %2648 = vmatpush3.bf16.msra.mxu1 %v2897_v26  ;;  %2631 = vmatprep.subr.bf16.mxu0 %v3114_v2  ;;  %v1580_v26 = vsel %vm452_vm2, %v1578_v21, %v1579_v22 }
  0x8c   : > { %2649 = vmatprep.subr.bf16.mxu1 %v3114_v2 }
  0x8e   : > { %2632 = vmatpush3.bf16.msra.mxu0 %v2898_v27  ;;  %v1709_v27 = vsel %vm710_vm5, %v1707_v24, %v1708_v25 }
  0x8f   : > { %2650 = vmatpush3.bf16.msra.mxu1 %v2899_v28  ;;  %2633 = vmatprep.subr.bf16.mxu0 %v3114_v2  ;;  %v419_v28 = vld [vmem:[#allocation2] sm:$0xff] }
  0x90   : > { %2651 = vmatprep.subr.bf16.mxu1 %v3114_v2 }
  0x92   : > { %2634 = vmatpush3.bf16.msra.mxu0 %v2900_v29 }
  0x93   : > { %2652 = vmatpush3.bf16.msra.mxu1 %v2901_v30  ;;  %2635 = vmatprep.subr.bf16.mxu0 %v3114_v2 }
  0x94   : > { %2653 = vmatprep.subr.bf16.mxu1 %v3114_v2 }
  0x96   : > { %2636 = vmatpush3.bf16.msra.mxu0 %v2902_v31 }
  0x97   : > { %2654 = vmatpush3.bf16.msra.mxu1 %v2903_v32  ;;  %2637 = vmatprep.subr.bf16.mxu0 %v3114_v2 }
  0x98   : > { %2655 = vmatprep.subr.bf16.mxu1 %v3114_v2 }
  0x9a   : > { %2638 = vmatpush3.bf16.msra.mxu0 %v2904_v33  ;;  %v420_v33 = vld [vmem:[#allocation2 + $0x10] sm:$0xff] }
  0x9b   : > { %2656 = vmatpush3.bf16.msra.mxu1 %v2905_v35  ;;  %2639 = vmatprep.subr.bf16.mxu0 %v3114_v2 }
  0x9c   : > { %2657 = vmatprep.subr.bf16.mxu1 %v3114_v2 }
  0x9e   : > { %2640 = vmatpush3.bf16.msra.mxu0 %v2906_v39 }
  0x9f   : > { %2658 = vmatpush3.bf16.msra.mxu1 %v2907_v42  ;;  %2663 = vmatprep.subr.bf16.mxu0 %v3114_v2 }
  0xa0   : > { %2681 = vmatprep.subr.bf16.mxu1 %v3114_v2 }
  0xa1   : > { %2642 = vmatmul.mubr.msk.bf16.vlgmr.msra.gmra.mxu0 %vm374_vm3, %v1095_v45 }
  0xa2   : > { %2660 = vmatmul.mubr.msk.bf16.vlgmr.msra.gmra.mxu1 %vm374_vm3, %v1216_v47  ;;  %2664 = vmatpush3.bf16.msra.mxu0 %v2912_v46 }
  0xa3   : > { %2682 = vmatpush3.bf16.msra.mxu1 %v2913_v48  ;;  %2665 = vmatprep.subr.bf16.mxu0 %v3114_v2 }
  0xa4   : > { %2683 = vmatprep.subr.bf16.mxu1 %v3114_v2  ;;  %2677 = vmatprep.mubr.msk.bf16.mxu0 %vm3115_vm0, %v3114_v2 }
  0xa5   : > { %2695 = vmatprep.mubr.msk.bf16.mxu1 %vm3115_vm0, %v3114_v2 }
  0xa6   : > { %2666 = vmatpush3.bf16.msra.mxu0 %v2914_v49 }
  0xa7   : > { %2684 = vmatpush3.bf16.msra.mxu1 %v2915_v50  ;;  %2667 = vmatprep.subr.bf16.mxu0 %v3114_v2 }
  0xa8   : > { %2685 = vmatprep.subr.bf16.mxu1 %v3114_v2 }
  0xaa   : > { %2668 = vmatpush3.bf16.msra.mxu0 %v2916_v51 }
  0xab   : > { %2686 = vmatpush3.bf16.msra.mxu1 %v2917_v52  ;;  %2669 = vmatprep.subr.bf16.mxu0 %v3114_v2 }
  0xac   : > { %2687 = vmatprep.subr.bf16.mxu1 %v3114_v2 }
  0xae   : > { %2670 = vmatpush3.bf16.msra.mxu0 %v2918_v53 }
  0xaf   : > { %2688 = vmatpush3.bf16.msra.mxu1 %v2919_v54  ;;  %2671 = vmatprep.subr.bf16.mxu0 %v3114_v2 }
  0xb0   : > { %2689 = vmatprep.subr.bf16.mxu1 %v3114_v2 }
  0xb2   : > { %2672 = vmatpush3.bf16.msra.mxu0 %v2920_v55 }
  0xb3   : > { %2690 = vmatpush3.bf16.msra.mxu1 %v2921_v56  ;;  %2673 = vmatprep.subr.bf16.mxu0 %v3114_v2 }
  0xb4   : > { %2691 = vmatprep.subr.bf16.mxu1 %v3114_v2 }
  0xb6   : > { %2674 = vmatpush3.bf16.msra.mxu0 %v2922_v57 }
  0xb7   : > { %2692 = vmatpush3.bf16.msra.mxu1 %v2923_v60  ;;  %2675 = vmatprep.subr.bf16.mxu0 %v3114_v2 }
  0xb8   : > { %2693 = vmatprep.subr.bf16.mxu1 %v3114_v2 }
  0xba   : > { %2676 = vmatpush3.bf16.msra.mxu0 %v2924_v61 }
  0xbb   : > { %2694 = vmatpush3.bf16.msra.mxu1 %v2925_v0  ;;  %2699 = vmatprep.subr.bf16.mxu0 %v3114_v2 }
  0xbc   : > { %2717 = vmatprep.subr.bf16.mxu1 %v3114_v2 }
  0xbd   : > { %2678 = vmatmul.mubr.msk.bf16.vlgmr.msra.gmra.mxu0 %vm374_vm3, %v1337_v1 }
  0xbe   : > { %2696 = vmatmul.mubr.msk.bf16.vlgmr.msra.gmra.mxu1 %vm374_vm3, %v2928_v3  ;;  %2700 = vmatpush3.bf16.msra.mxu0 %v2929_v4 }
  0xbf   : > { %2701 = vmatprep.subr.bf16.mxu0 %v3114_v2  ;;  %2718 = vmatpush3.bf16.msra.mxu1 %v2931_v5  ;;  %v1183_v5 = vld [vmem:[#allocation2 + $0x18] sm:$0xff] }
  0xc0   : > { %2719 = vmatprep.subr.bf16.mxu1 %v3114_v2  ;;  %2713 = vmatprep.mubr.msk.bf16.mxu0 %vm3115_vm0, %v3114_v2 }
  0xc1   : > { %2731 = vmatprep.mubr.msk.bf16.mxu1 %vm3115_vm0, %v3114_v2 }
  0xc2   : > { %2702 = vmatpush3.bf16.msra.mxu0 %v2930_v6 }
  0xc3   : > { %2703 = vmatprep.subr.bf16.mxu0 %v3114_v2  ;;  %2720 = vmatpush3.bf16.msra.mxu1 %v2933_v7 }
  0xc4   : > { %2721 = vmatprep.subr.bf16.mxu1 %v3114_v2 }
  0xc6   : > { %2704 = vmatpush3.bf16.msra.mxu0 %v2932_v8 }
  0xc7   : > { %2705 = vmatprep.subr.bf16.mxu0 %v3114_v2  ;;  %2722 = vmatpush3.bf16.msra.mxu1 %v2935_v9 }
  0xc8   : > { %2723 = vmatprep.subr.bf16.mxu1 %v3114_v2 }
  0xca   : > { %2706 = vmatpush3.bf16.msra.mxu0 %v2934_v10 }
  0xcb   : > { %2707 = vmatprep.subr.bf16.mxu0 %v3114_v2  ;;  %2724 = vmatpush3.bf16.msra.mxu1 %v2937_v11 }
  0xcc   : > { %2725 = vmatprep.subr.bf16.mxu1 %v3114_v2 }
  0xce   : > { %2708 = vmatpush3.bf16.msra.mxu0 %v2936_v12 }
  0xcf   : > { %2709 = vmatprep.subr.bf16.mxu0 %v3114_v2  ;;  %2726 = vmatpush3.bf16.msra.mxu1 %v2939_v13 }
  0xd0   : > { %2727 = vmatprep.subr.bf16.mxu1 %v3114_v2 }
  0xd2   : > { %2710 = vmatpush3.bf16.msra.mxu0 %v2938_v14 }
  0xd3   : > { %2711 = vmatprep.subr.bf16.mxu0 %v3114_v2  ;;  %2728 = vmatpush3.bf16.msra.mxu1 %v2941_v17 }
  0xd4   : > { %2729 = vmatprep.subr.bf16.mxu1 %v3114_v2 }
  0xd6   : > { %2712 = vmatpush3.bf16.msra.mxu0 %v2940_v20 }
  0xd7   : > { %2730 = vmatpush3.bf16.msra.mxu1 %v2944_v23 }
  0xd9   : > { %2714 = vmatmul.mubr.msk.bf16.vlgmr.msra.gmra.mxu0 %vm374_vm3, %v1580_v26 }
  0xda   : > { %2732 = vmatmul.mubr.msk.bf16.vlgmr.msra.gmra.mxu1 %vm374_vm3, %v1709_v27 }
 0x10d   : > { %v412_v29 = vpop.f32.mrf.mxu0 }
 0x10e   : > { %v421_v30 = vadd.f32 %v419_v28, %v412_v29  ;;  %v535_v31 = vpop.f32.mrf.mxu1 }
 0x10f   : > { %v2535_v32 = vpop.f32.mrf.mxu0 }
 0x110   : > { %424 = vst.msk [vmem:[#allocation2] sm:$0xff] %vm423_vm7, %v421_v30  ;;  %v2553_v2 = vpop.f32.mrf.mxu1 }
 0x111   : > { %v415_v34 = vpop.f32.mrf.mxu0 }
 0x112   : > { %v422_v35 = vadd.f32 %v420_v33, %v415_v34  ;;  %v538_v36 = vpop.f32.mrf.mxu1 }
 0x113   : > { %v2536_v37 = vpop.f32.mrf.mxu0 }
 0x114   : > { %425 = vst.msk [vmem:[#allocation2 + $0x10] sm:$0xff] %vm423_vm7, %v422_v35  ;;  %v2554_v38 = vpop.f32.mrf.mxu1 }
 0x117   : > { %v542_v39 = vld [vmem:[#allocation2] sm:$0xff] }
 0x118   : > { %v544_v40 = vadd.f32 %v542_v39, %v535_v31 }
 0x11a   : > { %546 = vst.msk [vmem:[#allocation2] sm:$0xff] %vm423_vm7, %v544_v40 }
 0x11b   : > { %v543_v41 = vld [vmem:[#allocation2 + $0x10] sm:$0xff] }
 0x11c   : > { %v545_v42 = vadd.f32 %v543_v41, %v538_v36 }
 0x11e   : > { %547 = vst.msk [vmem:[#allocation2 + $0x10] sm:$0xff] %vm423_vm7, %v545_v42 }
 0x121   : > { %v678_v44 = vld [vmem:[#allocation2] sm:$0xff] }
 0x125   : > { %v679_v50 = vld [vmem:[#allocation2 + $0x10] sm:$0xff] }
 0x129   : > { %v671_v43 = vpop.f32.mrf.mxu0 }
 0x12a   : > { %v680_v45 = vadd.f32 %v678_v44, %v671_v43  ;;  %v793_v46 = vpop.f32.mrf.mxu1 }
 0x12b   : > { %804 = vrot.lane.b32.xlu0 %v793_v46, %s3116_s21  ;;  %v2571_v47 = vpop.f32.mrf.mxu0 }
 0x12c   : > { %682 = vst.msk [vmem:[#allocation2] sm:$0xff] %vm423_vm7, %v680_v45  ;;  %v2589_v48 = vpop.f32.mrf.mxu1 }
 0x12d   : > { %v674_v49 = vpop.f32.mrf.mxu0 }
 0x12e   : > { %v681_v51 = vadd.f32 %v679_v50, %v674_v49  ;;  %v796_v52 = vpop.f32.mrf.mxu1 }
 0x12f   : > { %806 = vrot.lane.b32.xlu0 %v796_v52, %s3116_s21  ;;  %v2572_v53 = vpop.f32.mrf.mxu0 }
 0x130   : > { %683 = vst.msk [vmem:[#allocation2 + $0x10] sm:$0xff] %vm423_vm7, %v681_v51  ;;  %v2590_v54 = vpop.f32.mrf.mxu1 }
 0x133   : > { %v800_v33 = vld [vmem:[#allocation2] sm:$0xff] }
 0x137   : > { %v801_v39 = vld [vmem:[#allocation2 + $0x10] sm:$0xff] }
 0x145   : > { %v923_v55 = vpop.f32.mrf.mxu0 }
 0x146   : > { %934 = vrot.lane.b32.xlu0 %v923_v55, %s3116_s21  ;;  %v1045_v56 = vpop.f32.mrf.mxu1 }
 0x147   : > { %v2607_v57 = vpop.f32.mrf.mxu0 }
 0x148   : > { %v2625_v58 = vpop.f32.mrf.mxu1 }
 0x149   : > { %v926_v59 = vpop.f32.mrf.mxu0 }
 0x14a   : > { %v1048_v60 = vpop.f32.mrf.mxu1 }
 0x14b   : > { %v2608_v61 = vpop.f32.mrf.mxu0 }
 0x14c   : > { %v2626_v62 = vpop.f32.mrf.mxu1 }
 0x161   : > { %v1175_v0 = vpop.f32.mrf.mxu0 }
 0x162   : > { %v1184_v1 = vadd.f32 %v1182_v63, %v1175_v0  ;;  %v1296_v3 = vpop.f32.mrf.mxu1 }
 0x163   : > { %v2643_v4 = vpop.f32.mrf.mxu0 }
 0x164   : > { %1186 = vst.msk [vmem:[#allocation2 + $0x8] sm:$0xff] %vm423_vm7, %v1184_v1  ;;  %v2661_v6 = vpop.f32.mrf.mxu1 }
 0x165   : > { %v1178_v7 = vpop.f32.mrf.mxu0 }
 0x166   : > { %v1185_v8 = vadd.f32 %v1183_v5, %v1178_v7  ;;  %v1299_v9 = vpop.f32.mrf.mxu1 }
 0x167   : > { %v2644_v10 = vpop.f32.mrf.mxu0 }
 0x168   : > { %1187 = vst.msk [vmem:[#allocation2 + $0x18] sm:$0xff] %vm423_vm7, %v1185_v8  ;;  %v2662_v11 = vpop.f32.mrf.mxu1 }
 0x16b   : > { %v1303_v12 = vld [vmem:[#allocation2 + $0x8] sm:$0xff] }
 0x16c   : > { %v1305_v13 = vadd.f32 %v1303_v12, %v1296_v3 }
 0x16e   : > { %1307 = vst.msk [vmem:[#allocation2 + $0x8] sm:$0xff] %vm423_vm7, %v1305_v13 }
 0x16f   : > { %v1304_v14 = vld [vmem:[#allocation2 + $0x18] sm:$0xff] }
 0x170   : > { %v1306_v15 = vadd.f32 %v1304_v14, %v1299_v9 }
 0x172   : > { %1308 = vst.msk [vmem:[#allocation2 + $0x18] sm:$0xff] %vm423_vm7, %v1306_v15 }
 0x175   : > { %v1424_v17 = vld [vmem:[#allocation2 + $0x8] sm:$0xff] }
 0x179   : > { %v1425_v23 = vld [vmem:[#allocation2 + $0x18] sm:$0xff] }
 0x17d   : > { %v1417_v16 = vpop.f32.mrf.mxu0 }
 0x17e   : > { %v1426_v18 = vadd.f32 %v1424_v17, %v1417_v16  ;;  %v1531_v19 = vpop.f32.mrf.mxu1 }
 0x17f   : > { %1542 = vrot.lane.b32.xlu1 %v1531_v19, %s3116_s21  ;;  %v2679_v20 = vpop.f32.mrf.mxu0 }
 0x180   : > { %1428 = vst.msk [vmem:[#allocation2 + $0x8] sm:$0xff] %vm423_vm7, %v1426_v18  ;;  %v2697_v21 = vpop.f32.mrf.mxu1 }
 0x181   : > { %v1420_v22 = vpop.f32.mrf.mxu0 }
 0x182   : > { %v1427_v24 = vadd.f32 %v1425_v23, %v1420_v22  ;;  %v1534_v25 = vpop.f32.mrf.mxu1 }
 0x183   : > { %1544 = vrot.lane.b32.xlu1 %v1534_v25, %s3116_s21  ;;  %v2680_v26 = vpop.f32.mrf.mxu0 }
 0x184   : > { %1429 = vst.msk [vmem:[#allocation2 + $0x18] sm:$0xff] %vm423_vm7, %v1427_v24  ;;  %v2698_v27 = vpop.f32.mrf.mxu1 }
 0x187   : > { %936 = vrot.lane.b32.xlu1 %v926_v59, %s3116_s21  ;;  %v1538_v45 = vld [vmem:[#allocation2 + $0x8] sm:$0xff] }
 0x18b   : > { %v1539_v48 = vld [vmem:[#allocation2 + $0x18] sm:$0xff] }
 0x199   : > { %v1660_v28 = vpop.f32.mrf.mxu0 }
 0x19a   : > { %1671 = vrot.lane.b32.xlu0 %v1660_v28, %s3116_s21  ;;  %v1789_v29 = vpop.f32.mrf.mxu1 }
 0x19b   : > { %v2715_v30 = vpop.f32.mrf.mxu0 }
 0x19c   : > { %v2733_v31 = vpop.f32.mrf.mxu1 }
 0x19d   : > { %v805_v32 = vpop.permute.xlu0 %804  ;;  %v1663_v2 = vpop.f32.mrf.mxu0 }
 0x19e   : > { %v810_v34 = vadd.f32 %v805_v32, %v800_v33  ;;  %1056 = vrot.lane.b32.xlu0 %v1045_v56, %s3116_s21  ;;  %1673 = vrot.lane.b32.xlu1 %v1663_v2, %s3116_s21  ;;  %v1792_v35 = vpop.f32.mrf.mxu1 }
 0x19f   : > { %v2716_v36 = vpop.f32.mrf.mxu0 }
 0x1a0   : > { %813 = vst.msk [vmem:[#allocation2] sm:$0xff] %vm812_vm8, %v810_v34  ;;  %v2734_v37 = vpop.f32.mrf.mxu1 }
 0x1a1   : > { %v807_v38 = vpop.permute.xlu0 %806 }
 0x1a2   : > { %v811_v40 = vadd.f32 %v807_v38, %v801_v39  ;;  %1058 = vrot.lane.b32.xlu1 %v1048_v60, %s3116_s21  ;;  %1800 = vrot.lane.b32.xlu0 %v1789_v29, %s3116_s21 }
 0x1a4   : > { %814 = vst.msk [vmem:[#allocation2 + $0x10] sm:$0xff] %vm812_vm8, %v811_v40 }
 0x1a6   : > { %1802 = vrot.lane.b32.xlu1 %v1792_v35, %s3116_s21 }
 0x1a7   : > { %v930_v41 = vld [vmem:[#allocation2] sm:$0xff] }
 0x1ab   : > { %v931_v50 = vld [vmem:[#allocation2 + $0x10] sm:$0xff] }
 0x1b8   : > { %v935_v42 = vpop.permute.xlu0 %934 }
 0x1b9   : > { %v940_v43 = vadd.f32 %v935_v42, %v930_v41 }
 0x1bb   : > { %942 = vst.msk [vmem:[#allocation2] sm:$0xff] %vm812_vm8, %v940_v43 }
 0x1c2   : > { %v1052_v56 = vld [vmem:[#allocation2] sm:$0xff] }
 0x1f1   : > { %v1543_v44 = vpop.permute.xlu1 %1542 }
 0x1f2   : > { %v1548_v46 = vadd.f32 %v1543_v44, %v1538_v45 }
 0x1f4   : > { %1550 = vst.msk [vmem:[#allocation2 + $0x8] sm:$0xff] %vm812_vm8, %v1548_v46 }
 0x1f5   : > { %v1545_v47 = vpop.permute.xlu1 %1544 }
 0x1f6   : > { %v1549_v49 = vadd.f32 %v1545_v47, %v1539_v48 }
 0x1f8   : > { %1551 = vst.msk [vmem:[#allocation2 + $0x18] sm:$0xff] %vm812_vm8, %v1549_v49 }
 0x1f9   : > { %v937_v51 = vpop.permute.xlu1 %936 }
 0x1fa   : > { %v941_v52 = vadd.f32 %v937_v51, %v931_v50 }
 0x1fb   : > { %v1667_v53 = vld [vmem:[#allocation2 + $0x8] sm:$0xff] }
 0x1fc   : > { %943 = vst.msk [vmem:[#allocation2 + $0x10] sm:$0xff] %vm812_vm8, %v941_v52 }
 0x1ff   : > { %v1668_v58 = vld [vmem:[#allocation2 + $0x18] sm:$0xff] }
 0x203   : > { %v1053_v62 = vld [vmem:[#allocation2 + $0x10] sm:$0xff] }
 0x20c   : > { %v1672_v54 = vpop.permute.xlu0 %1671 }
 0x20d   : > { %v1677_v55 = vadd.f32 %v1672_v54, %v1667_v53 }
 0x20f   : > { %1679 = vst.msk [vmem:[#allocation2 + $0x8] sm:$0xff] %vm812_vm8, %v1677_v55 }
 0x210   : > { %v1057_v57 = vpop.permute.xlu0 %1056  ;;  %v1674_v59 = vpop.permute.xlu1 %1673 }
 0x211   : > { %v1062_v60 = vadd.f32 %v1057_v57, %v1052_v56  ;;  %v1678_v61 = vadd.f32 %v1674_v59, %v1668_v58 }
 0x213   : > { %1064 = vst.msk [vmem:[#allocation2] sm:$0xff] %vm812_vm8, %v1062_v60  ;;  %1680 = vst.msk [vmem:[#allocation2 + $0x18] sm:$0xff] %vm812_vm8, %v1678_v61 }
 0x214   : > { %v1059_v63 = vpop.permute.xlu1 %1058  ;;  %v1801_v0 = vpop.permute.xlu0 %1800 }
 0x215   : > { %v1063_v1 = vadd.f32 %v1059_v63, %v1053_v62 }
 0x216   : > { %v1796_v3 = vld [vmem:[#allocation2 + $0x8] sm:$0xff] }
 0x217   : > { %1065 = vst.msk [vmem:[#allocation2 + $0x10] sm:$0xff] %vm812_vm8, %v1063_v1  ;;  %v1806_v4 = vadd.f32 %v1801_v0, %v1796_v3 }
 0x218   : > { %v1803_v6 = vpop.permute.xlu1 %1802 }
 0x219   : > { %1808 = vst.msk [vmem:[#allocation2 + $0x8] sm:$0xff] %vm812_vm8, %v1806_v4  ;;  %1813 = sbr.rel (%p2408_p3) target bundleno = 572 (0x23c), region = 36 }
 0x21a   : > { %v1797_v5 = vld [vmem:[#allocation2 + $0x18] sm:$0xff] }
 0x21b   : > { %v1807_v7 = vadd.f32 %v1803_v6, %v1797_v5 }
 0x21d   : > { %1809 = vst.msk [vmem:[#allocation2 + $0x18] sm:$0xff] %vm812_vm8, %v1807_v7 }
 0x21e   : > { %v1814_v8 = vld [vmem:[#allocation2] sm:$0xff]  ;;  %v1816_v10 = vld [vmem:[#allocation2 + $0x10] sm:$0xff]  ;;  %v3117_v26 = vmov 1966171168   ;;  %v1842_v28 = vlaneseq }
 0x21f   : > { %1818 = vst [vmem:[%s3258_s17] sm:$0xff] %v1814_v8  ;;  %v1859_v11 = vmul.f32 %v1814_v8, %v1814_v8  ;;  %1820 = vst [vmem:[%s3258_s17 + $0x10] sm:$0xff] %v1816_v10  ;;  %v1822_v13 = vadd.f32 %v1816_v10, %v1814_v8  ;;  %v1861_v14 = vmul.f32 %v1816_v10, %v1816_v10  ;;  %v1840_v27 = vunpack.c.l.s4 %v3117_v26 }
 0x220   : > { %v1815_v9 = vld [vmem:[#allocation2 + $0x8] sm:$0xff]  ;;  %v1843_v37 = vshrl.u32 %v1842_v28, 7  ;;  %vm1856_vm9 = vcmp.lt.s32.totalorder %v1842_v28, 256 }
 0x221   : > { %1819 = vst [vmem:[%s3258_s17 + $0x8] sm:$0xff] %v1815_v9  ;;  %v1860_v12 = vmul.f32 %v1815_v9, %v1815_v9  ;;  %v1823_v18 = vrot.slane %v1822_v13, 4  ;;  %v1863_v19 = vadd.f32 %v1861_v14, %v1859_v11  ;;  %v1841_v36 = vunpack.c.0.s8 %v1840_v27 }
 0x223   : > { %v1824_v22 = vadd.f32 %v1823_v18, %v1822_v13  ;;  %v1864_v23 = vrot.slane %v1863_v19, 4  ;;  %v1844_v45 = vsub.s32 %v1841_v36, %v1843_v37 }
 0x224   : > { %v1817_v15 = vld [vmem:[#allocation2 + $0x18] sm:$0xff] }
 0x225   : > { %1821 = vst [vmem:[%s3258_s17 + $0x18] sm:$0xff] %v1817_v15  ;;  %v1829_v16 = vadd.f32 %v1817_v15, %v1815_v9  ;;  %v1862_v17 = vmul.f32 %v1817_v15, %v1817_v15  ;;  %v1825_v29 = vrot.slane %v1824_v22, 2  ;;  %v1865_v30 = vadd.f32 %v1864_v23, %v1863_v19 }
 0x227   : > { %v1830_v20 = vrot.slane %v1829_v16, 4  ;;  %v1870_v21 = vadd.f32 %v1862_v17, %v1860_v12  ;;  %v1826_v33 = vadd.f32 %v1825_v29, %v1824_v22  ;;  %v1866_v2 = vrot.slane %v1865_v30, 2 }
 0x229   : > { %v1831_v24 = vadd.f32 %v1830_v20, %v1829_v16  ;;  %v1871_v25 = vrot.slane %v1870_v21, 4  ;;  %v1827_v38 = vrot.slane %v1826_v33, 1  ;;  %v1867_v39 = vadd.f32 %v1866_v2, %v1865_v30 }
 0x22b   : > { %v1832_v31 = vrot.slane %v1831_v24, 2  ;;  %v1872_v32 = vadd.f32 %v1871_v25, %v1870_v21  ;;  %v1828_v42 = vadd.f32 %v1827_v38, %v1826_v33  ;;  %v1868_v43 = vrot.slane %v1867_v39, 1 }
 0x22d   : > { %v1833_v34 = vadd.f32 %v1832_v31, %v1831_v24  ;;  %v1873_v35 = vrot.slane %v1872_v32, 2  ;;  %v1869_v47 = vadd.f32 %v1868_v43, %v1867_v39 }
 0x22f   : > { %v1834_v40 = vrot.slane %v1833_v34, 1  ;;  %v1874_v41 = vadd.f32 %v1873_v35, %v1872_v32 }
 0x231   : > { %v1835_v44 = vadd.f32 %v1834_v40, %v1833_v34  ;;  %v1875_v46 = vrot.slane %v1874_v41, 1 }
 0x233   : > { %v1838_v48 = vcombine.low %v1828_v42, %v1835_v44  ;;  %v1876_v49 = vadd.f32 %v1875_v46, %v1874_v41 }
 0x235   : > { %v1845_v50 = vrot.slane %v1838_v48, %v1844_v45  ;;  %v1879_v51 = vcombine.low %v1869_v47, %v1876_v49 }
 0x237   : > { %v1852_v52 = vrot.slane %v1845_v50, %v1844_v45  ;;  %v1886_v53 = vrot.slane %v1879_v51, %v1844_v45 }
 0x239   : > { %1858 = vst.msk [vmem:[%s3260_s16] sm:$0x3] %vm1856_vm9, %v1852_v52  ;;  %v1893_v54 = vrot.slane %v1886_v53, %v1844_v45 }
 0x23b   : > { %1895 = vst.msk [vmem:[%s3262_s12] sm:$0x3] %vm1856_vm9, %v1893_v54 }
 0x23c PF: > { %s3692_s18 = sadd.s32 4294967295, %s3111_s24   ;;  %s2415_s23 = sshll.u32 %s3091_s19, 1 }
 0x23d   : > { %s3544_s22 = sand.u32 1, %s3692_s18   ;;  %s2416_s25 = sshll.u32 %s3095_s20, 3 }
 0x23e   : > { %s3548_s26 = sadd.s32 %s2416_s25, %s2415_s23  ;;  %s1941_s27 = sshll.u32 %s3260_s16, 4  ;;  %s1942_s27 = int_to_ptr.vmem [resolvable:$true] %s1941_s27 }
 0x23f   : > { %s2417_s28 = sshll.u32 %s3548_s26, 4  ;;  %s1902_s14 = scalar_lea.sflag [#allocation6], %s3544_s22 }
 0x240   : > { %s1939_s13 = scalar_lea.hbm %s3670_s3, %s2417_s28  ;;  %s2947_s6 = scalar_lea.vmem %s1942_s27, 32 }
 0x241   : > { %p2948_p4 = scmp.ne.s32.totalorder %s1942_s27, %s2947_s6  ;;  %s3118_s7 = smov [#allocation5]  }
 0x242   : > { %s2951_s8 = sshll.u32 %s3118_s7, 4  ;;  %s2952_s8 = int_to_ptr.vmem [resolvable:$false] %s2951_s8 }
 0x243   : > { %p2949_p5 = pnand %p2948_p4, %p3214_p6  ;;  %s2953_s9 = scalar_lea.vmem %s2952_s8, 64 }
 0x244   : > { %p2954_p9 = scmp.lt.s32.totalorder %s1942_s27, %s2952_s8  ;;  %p2955_p10 = scmp.lt.s32.totalorder %s2953_s9, %s2947_s6 }
 0x245   : > { %p2950_p8 = pneg %p2949_p5 }
 0x246   : > { %p2956_p11 = por %p2955_p10, %p2954_p9 }
 0x248   : > { %p2957_p12 = pnand %p2956_p11, %p2950_p8 }
 0x24a   : > { %2960 = shalt.err (!%p2957_p12)
}
 0x24b   : > { %s2961_s16 = scalar_lea.hbm %s1939_s13, 32  ;;  %s2965_s23 = scalar_lea.hbm %s3670_s3, 256 }
 0x24c   : > { %p2962_p13 = scmp.ne.s32.totalorder %s1939_s13, %s2961_s16  ;;  %p2966_p2 = scmp.lt.s32.totalorder %s1939_s13, %s3670_s3 }
 0x24d   : > { %p2967_p3 = scmp.lt.s32.totalorder %s2965_s23, %s2961_s16 }
 0x24e   : > { %p2963_p0 = pnand %p2962_p13, %p3214_p6 }
 0x24f   : > { %p2968_p4 = por %p2967_p3, %p2966_p2 }
 0x250   : > { %p2964_p1 = pneg %p2963_p0 }
 0x252   : > { %p2969_p5 = pnand %p2968_p4, %p2964_p1 }
 0x254   : > { %2972 = shalt.err (!%p2969_p5)
}
 0x255   : > { %2738 = dma.vmem_to_hbm [thread:$0]  (%p3214_p6), %s1942_s27, 32, %s1939_s13, %s1902_s14  }
 0x256   : > { %s2412_s10 = sshll.u32 %s3091_s19, 2  ;;  %s2413_s6 = sshll.u32 %s3095_s20, 4 }
 0x257   : > { %s1919_s7 = sadd.s32 %s2413_s6, %s2412_s10  ;;  %s1922_s8 = sshll.u32 %s3258_s17, 4  ;;  %s3575_s8 = int_to_ptr.vmem [resolvable:$true] %s1922_s8 }
 0x258   : > { %s2414_s9 = sshll.u32 %s1919_s7, 7  ;;  %s3587_s27 = scalar_lea.hbm %s3671_s4, %s2417_s28 }
 0x259   : > { %s3580_s18 = scalar_lea.hbm %s3669_s2, %s2414_s9  ;;  %s1897_s19 = scalar_lea.sflag [#allocation4], %s3238_s11 }
 0x25a   : > { %s2973_s20 = scalar_lea.vmem %s3575_s8, 512  ;;  %s3119_s17 = smov [#allocation3]  }
 0x25b   : > { %p2974_p8 = scmp.ne.s32.totalorder %s3575_s8, %s2973_s20  ;;  %s2977_s13 = sshll.u32 %s3119_s17, 4  ;;  %s2978_s13 = int_to_ptr.vmem [resolvable:$false] %s2977_s13 }
 0x25c   : > { %s2979_s29 = scalar_lea.vmem %s2978_s13, 1024  ;;  %p2980_p11 = scmp.lt.s32.totalorder %s3575_s8, %s2978_s13 }
 0x25d   : > { %p2975_p9 = pnand %p2974_p8, %p3214_p6  ;;  %p2981_p12 = scmp.lt.s32.totalorder %s2979_s29, %s2973_s20 }
 0x25f   : > { %p2976_p10 = pneg %p2975_p9  ;;  %p2982_p13 = por %p2981_p12, %p2980_p11 }
 0x261   : > { %p2983_p0 = pnand %p2982_p13, %p2976_p10 }
 0x263   : > { %2986 = shalt.err (!%p2983_p0)
}
 0x264   : > { %s2987_s26 = scalar_lea.hbm %s3580_s18, 512  ;;  %s2991_s6 = scalar_lea.hbm %s3669_s2, 4096 }
 0x265   : > { %p2988_p1 = scmp.ne.s32.totalorder %s3580_s18, %s2987_s26  ;;  %p2992_p4 = scmp.lt.s32.totalorder %s3580_s18, %s3669_s2 }
 0x266   : > { %p2993_p5 = scmp.lt.s32.totalorder %s2991_s6, %s2987_s26 }
 0x267   : > { %p2989_p2 = pnand %p2988_p1, %p3214_p6 }
 0x268   : > { %p2994_p8 = por %p2993_p5, %p2992_p4 }
 0x269   : > { %p2990_p3 = pneg %p2989_p2 }
 0x26b   : > { %p2995_p9 = pnand %p2994_p8, %p2990_p3 }
 0x26d   : > { %2998 = shalt.err (!%p2995_p9)
}
 0x26e   : > { %s3120_s16 = smov 256   ;;  %s3121_s21 = smov 16  }
 0x26f   : > { %2737 = dma.vmem_to_hbm [thread:$0]  (%p3214_p6), %s3575_s8, 512, %s3580_s18, %s1897_s19, %s3120_s16, %s3120_s16, %s3121_s21  }
 0x270   : > { %s1957_s23 = sshll.u32 %s3262_s12, 4  ;;  %s3122_s20 = smov [#allocation7]   ;;  %s1958_s23 = int_to_ptr.vmem [resolvable:$true] %s1957_s23 }
 0x271   : > { %s2999_s25 = scalar_lea.vmem %s1958_s23, 32  ;;  %s3003_s17 = sshll.u32 %s3122_s20, 4  ;;  %s3004_s17 = int_to_ptr.vmem [resolvable:$false] %s3003_s17 }
 0x272   : > { %p3000_p10 = scmp.ne.s32.totalorder %s1958_s23, %s2999_s25  ;;  %s3005_s13 = scalar_lea.vmem %s3004_s17, 64 }
 0x273   : > { %p3006_p13 = scmp.lt.s32.totalorder %s1958_s23, %s3004_s17  ;;  %p3007_p0 = scmp.lt.s32.totalorder %s3005_s13, %s2999_s25 }
 0x274   : > { %p3001_p11 = pnand %p3000_p10, %p3214_p6 }
 0x275   : > { %p3008_p1 = por %p3007_p0, %p3006_p13 }
 0x276   : > { %p3002_p12 = pneg %p3001_p11 }
 0x278   : > { %p3009_p2 = pnand %p3008_p1, %p3002_p12 }
 0x27a   : > { %3012 = shalt.err (!%p3009_p2)
}
 0x27b   : > { %s3013_s11 = scalar_lea.hbm %s3587_s27, 32  ;;  %s3017_s18 = scalar_lea.hbm %s3671_s4, 256 }
 0x27c   : > { %p3014_p3 = scmp.ne.s32.totalorder %s3587_s27, %s3013_s11  ;;  %p3018_p8 = scmp.lt.s32.totalorder %s3587_s27, %s3671_s4 }
 0x27d   : > { %p3019_p9 = scmp.lt.s32.totalorder %s3017_s18, %s3013_s11 }
 0x27e   : > { %p3015_p4 = pnand %p3014_p3, %p3214_p6 }
 0x27f   : > { %p3020_p10 = por %p3019_p9, %p3018_p8 }
 0x280   : > { %p3016_p5 = pneg %p3015_p4 }
 0x282   : > { %p3021_p11 = pnand %p3020_p10, %p3016_p5 }
 0x284   : > { %3024 = shalt.err (!%p3021_p11)
}
 0x285   : > { %2739 = dma.vmem_to_hbm [thread:$0]  (%p3214_p6), %s1958_s23, 32, %s3587_s27, %s1902_s14  }
 0x286 PF: > { %p2753_p12 = scmp.ge.s32.totalorder %s3111_s24, 2  ;;  %s1969_s26 = sand.u32 1, %s3075_s15  }
 0x287   : > { %s1970_s28 = scalar_lea.sflag [#allocation4], %s1969_s26 }
 0x288   : > { %p2744_p13 = pnand %p2753_p12, %p3221_p7 }
 0x28a   : > { %p2745_p0 = pneg %p2744_p13 }
 0x28c   : > { %3066 = dma.done.wait (%p2745_p0), %s1970_s28, 512  }
 0x28d   : > { %3068 = vsyncadd (%p2745_p0), %s1970_s28, 4294966784  ;;  %s3693_s10 = sadd.s32 4294967294, %s3111_s24  }
 0x28e   : > { %s1978_s6 = sand.u32 1, %s3693_s10  }
 0x28f   : > { %s1979_s30 = scalar_lea.sflag [#allocation6], %s1978_s6 }
 0x290   : > { %3070 = dma.done.wait (%p2745_p0), %s1979_s30, 64  }
 0x291   : > { %3072 = vsyncadd (%p2745_p0), %s1979_s30, 4294967232  ;;  %s21_s24 = sadd.s32 1, %s3111_s24   ;;  %s3694_s15 = sld [smem:[#allocation10_spill]] }
 0x292   : > { %p18_p6 = scmp.ge.s32.totalorder %s21_s24, 26   ;;  %s3695_s16 = sld [smem:[#allocation11_spill]] }
 0x293   : > { %s3696_s17 = sld [smem:[#allocation18_spill]] }
 0x294   : > { %s3697_s18 = sld [smem:[#allocation12_spill]] }
 0x295   : > { %s3698_s19 = sld [smem:[#allocation13_spill]]  ;;  %20 = sbr.rel (!%p18_p6) target bundleno = 8 (0x8), region = 117 }
 0x296   : > { %s3699_s20 = sld [smem:[#allocation14_spill]] }
 0x297   : > { %s3700_s21 = sld [smem:[#allocation15_spill]] }
 0x298   : > { %s3701_s22 = sld [smem:[#allocation16_spill]] }
 0x299   : > { %s3702_s23 = sld [smem:[#allocation17_spill]] }
 0x29a   :  { %1993 = vsyncpa [#allocation4], 1 }
 0x29b   :  { %1995 = vsyncpa [#allocation4 + $0x1], 1 }
 0x29c   :  { %1996 = vsyncpa [#allocation6], 1 }
 0x29d   :  { %1998 = vsyncpa [#allocation6 + $0x1], 1 }

</bundles_post_ra>
